<compile_context>
chip_gen: v7x
topology: tpu7x:2x2x1
jax: 0.10.0
libtpu: 0.0.40
codegen_flags: <defaults>
</compile_context>

<pallas_src>
import jax
import jax.numpy as jnp
from jax.experimental import pallas as pl
from jax.experimental.pallas import tpu as pltpu


def _round_up(x, m):
    return ((x + m - 1) // m) * m


# ----------------------------------------------------------------------------
# Pallas kernel: (im2col-patches @ weight) + bias + ReLU
#   p_ref: (TM, K_pad) bf16   w_ref: (K_pad, TN) bf16
#   b_ref: (1, TN)     f32    o_ref: (TM, TN)    bf16
# ----------------------------------------------------------------------------
def _matmul_bias_relu_kernel(p_ref, w_ref, b_ref, o_ref):
    acc = jnp.dot(p_ref[...], w_ref[...], preferred_element_type=jnp.float32)
    acc = acc + b_ref[...]
    o_ref[...] = jnp.maximum(acc, 0.0).astype(o_ref.dtype)


def conv2d_relu_pallas(x, w2d, b2d, cout, *, kh, kw, stride, padding):
    """NHWC conv2d + bias + ReLU as a tiled Pallas matmul.

    x:    (B, H, W, Cin) bf16
    w2d:  (K_pad, N_pad) bf16, K laid out (kh, kw, Cin), both dims pre-padded
    b2d:  (1, N_pad) f32
    returns (B, Ho, Wo, cout) bf16
    """
    B, H, W, Cin = x.shape
    K_pad, N_pad = w2d.shape
    K = kh * kw * Cin
    Ho = (H + 2 * padding - kh) // stride + 1
    Wo = (W + 2 * padding - kw) // stride + 1
    M = B * Ho * Wo

    # im2col in NHWC: strided tap slices concatenated on the channel axis.
    # No transposes -- (B,Ho,Wo,K) -> (M,K) is a free row-major reshape.
    xp = jnp.pad(x, ((0, 0), (padding, padding), (padding, padding), (0, 0)))
    taps = []
    for i in range(kh):
        for j in range(kw):
            taps.append(xp[:, i:i + stride * Ho:stride, j:j + stride * Wo:stride, :])
    patches = jnp.concatenate(taps, axis=-1).reshape(M, K)

    TM = min(512, _round_up(M, 8))            # MXU-friendly row tile
    M_pad = _round_up(M, TM)
    TN = 256 if (N_pad % 256 == 0) else 128   # lane-dense output tile

    patches = jnp.pad(patches, ((0, M_pad - M), (0, K_pad - K)))

    out = pl.pallas_call(
        _matmul_bias_relu_kernel,
        out_shape=jax.ShapeDtypeStruct((M_pad, N_pad), jnp.bfloat16),
        grid_spec=pltpu.PrefetchScalarGridSpec(
            num_scalar_prefetch=0,
            grid=(M_pad // TM, N_pad // TN),
            in_specs=[
                pl.BlockSpec((TM, K_pad), lambda i, j: (i, 0)),   # patch rows
                pl.BlockSpec((K_pad, TN), lambda i, j: (0, j)),   # weight cols
                pl.BlockSpec((1, TN), lambda i, j: (0, j)),       # bias
            ],
            out_specs=pl.BlockSpec((TM, TN), lambda i, j: (i, j)),
        ),
        compiler_params=pltpu.CompilerParams(
            dimension_semantics=("parallel", "parallel")),
    )(patches, w2d, b2d)

    return out[:M, :cout].reshape(B, Ho, Wo, cout)


# ----------------------------------------------------------------------------
# Mask resampling: F.interpolate(m[None].float(), size=hw).to(bool)[0]
# (default 'nearest' mode) -- exact integer nearest indices.
# ----------------------------------------------------------------------------
def interpolate_mask_nearest(mask, out_hw):
    B, H, W = mask.shape
    Ho, Wo = out_hw
    src_h = (jnp.arange(Ho) * H) // Ho
    src_w = (jnp.arange(Wo) * W) // Wo
    return mask[:, src_h][:, :, src_w]


# ----------------------------------------------------------------------------
# BackboneBase equivalent (return_interm_layers=True, resnet-style naming)
# ----------------------------------------------------------------------------
class BackboneBasePallas:
    def __init__(self, key, channels=(3, 16, 32, 64, 128, 256), kh=3, kw=3):
        # strides / num_channels mirror the torch module's bookkeeping
        self.strides = [8, 16, 32]
        self.num_channels = [channels[3], channels[4], channels[5]]
        self.kh, self.kw = kh, kw
        # TODO(synk): the real module wraps an externally supplied pretrained
        # ResNet/DenseNet via IntermediateLayerGetter; this is a deterministic
        # synthetic conv stack whose taps play layer2/layer3/layer4.
        self.layers = []
        for cin, cout in zip(channels[:-1], channels[1:]):
            key, wk, bk = jax.random.split(key, 3)
            fan_in = cin * kh * kw
            w = jax.random.normal(wk, (cout, cin, kh, kw), jnp.float32) * (fan_in ** -0.5)
            b = jax.random.normal(bk, (cout,), jnp.float32) * 0.01
            K = cin * kh * kw
            K_pad = _round_up(K, 128)          # lane-dense patches, 16-aligned sublanes
            N_pad = _round_up(cout, 128)       # lane-dense output stores
            # K layout (kh, kw, Cin) to match the patch concatenation order.
            w2d = jnp.transpose(w, (2, 3, 1, 0)).reshape(K, cout)
            w2d = jnp.pad(w2d, ((0, K_pad - K), (0, N_pad - cout))).astype(jnp.bfloat16)
            b2d = jnp.pad(b, (0, N_pad - cout)).reshape(1, N_pad).astype(jnp.float32)
            self.layers.append((w2d, b2d, cout))
        # conv indices acting as layer2 / layer3 / layer4 tap points
        self._return_layers = {2: '0', 3: '1', 4: '2'}

    def __call__(self, tensors, mask):
        # tensors: (B, 3, H, W) f32 (NCHW module boundary)
        # mask:    (B, H, W) bool (True = padded pixel)
        x = jnp.transpose(tensors, (0, 2, 3, 1)).astype(jnp.bfloat16)  # NHWC, bf16 inside
        feats = {}
        for li, (w2d, b2d, cout) in enumerate(self.layers):
            x = conv2d_relu_pallas(x, w2d, b2d, cout,
                                   kh=self.kh, kw=self.kw, stride=2, padding=1)
            if li in self._return_layers:
                feats[self._return_layers[li]] = x

        out = {}
        for name, f in feats.items():
            assert mask is not None
            m = interpolate_mask_nearest(mask, f.shape[1:3])
            f_nchw = jnp.transpose(f, (0, 3, 1, 2)).astype(jnp.float32)  # NCHW f32 boundary
            out[name] = (f_nchw, m)                 # NestedTensor(x, mask)
        return out

    # Pure-JAX reference (lax conv, same bf16 rounding points) for validation.
    def reference(self, tensors, mask):
        x = jnp.transpose(tensors, (0, 2, 3, 1)).astype(jnp.bfloat16)
        feats = {}
        for li, (w2d, b2d, cout) in enumerate(self.layers):
            cin = x.shape[-1]
            K = self.kh * self.kw * cin
            w_hwio = w2d[:K, :cout].astype(jnp.float32).reshape(self.kh, self.kw, cin, cout)
            y = jax.lax.conv_general_dilated(
                x.astype(jnp.float32), w_hwio,
                window_strides=(2, 2), padding=((1, 1), (1, 1)),
                dimension_numbers=("NHWC", "HWIO", "NHWC"))
            y = y + b2d[0, :cout]
            x = jnp.maximum(y, 0.0).astype(jnp.bfloat16)
            if li in self._return_layers:
                feats[self._return_layers[li]] = x
        out = {}
        for name, f in feats.items():
            m = interpolate_mask_nearest(mask, f.shape[1:3])
            out[name] = (jnp.transpose(f, (0, 3, 1, 2)).astype(jnp.float32), m)
        return out


if __name__ == "__main__":
    key = jax.random.PRNGKey(0)
    k_param, k_img = jax.random.split(key)

    B, C, H, W = 2, 3, 32, 32
    tensors = jax.random.normal(k_img, (B, C, H, W), jnp.float32)

    # synthetic padding mask (True where padded), deterministic
    hh = jnp.arange(H)[None, :, None]
    ww = jnp.arange(W)[None, None, :]
    valid_h = jnp.array([28, 20])[:, None, None]
    valid_w = jnp.array([32, 24])[:, None, None]
    mask = (hh >= valid_h) | (ww >= valid_w)       # (B, H, W) bool

    model = BackboneBasePallas(k_param)
    forward = jax.jit(lambda t, m: model(t, m))
    out = forward(tensors, mask)
    out = jax.block_until_ready(out)

    # shape / dtype checks (layer2/3/4 -> strides 8/16/32, NCHW f32 boundary)
    assert out['0'][0].shape == (B, 64, H // 8, W // 8)
    assert out['1'][0].shape == (B, 128, H // 16, W // 16)
    assert out['2'][0].shape == (B, 256, H // 32, W // 32)
    assert out['0'][0].dtype == jnp.float32
    assert out['0'][1].shape == (B, H // 8, W // 8) and out['0'][1].dtype == jnp.bool_

    # numerical check vs lax.conv reference (identical bf16 rounding points)
    ref = jax.jit(lambda t, m: model.reference(t, m))(tensors, mask)
    ref = jax.block_until_ready(ref)
    for name in ('0', '1', '2'):
        f_k, m_k = out[name]
        f_r, m_r = ref[name]
        assert bool(jnp.array_equal(m_k, m_r))
        err = jnp.max(jnp.abs(f_k - f_r))
        assert float(err) < 1e-2, f"layer {name} max abs err {float(err)}"

    print("KERNEL_OK")
</pallas_src>

<mosaic_0001>
module attributes {stable_mosaic.version = 11 : i64} {
  func.func @_matmul_bias_relu_kernel(%arg0: i32, %arg1: i32, %arg2: memref<512x128xbf16, #tpu.memory_space<vmem>>, %arg3: memref<128x128xbf16, #tpu.memory_space<vmem>>, %arg4: memref<1x128xf32, #tpu.memory_space<vmem>>, %arg5: memref<512x128xbf16, #tpu.memory_space<vmem>>) attributes {dimension_semantics = [#tpu.dimension_semantics<parallel>, #tpu.dimension_semantics<parallel>], iteration_bounds = array<i64: 1, 1>, scalar_prefetch = 0 : i64, scratch_operands = 0 : i64, tpu.core_type = #tpu.core_type<tc>, window_params = [{transform_indices = @transform_0, window_bounds = array<i64: 512, 128>}, {transform_indices = @transform_1, window_bounds = array<i64: 128, 128>}, {transform_indices = @transform_2, window_bounds = array<i64: 1, 128>}, {transform_indices = @transform_3, window_bounds = array<i64: 512, 128>}]} {
    %c0 = arith.constant 0 : index
    %c0_0 = arith.constant 0 : index
    %0 = vector.load %arg2[%c0, %c0_0] : memref<512x128xbf16, #tpu.memory_space<vmem>>, vector<512x128xbf16>
    %c0_1 = arith.constant 0 : index
    %c0_2 = arith.constant 0 : index
    %1 = vector.load %arg3[%c0_1, %c0_2] : memref<128x128xbf16, #tpu.memory_space<vmem>>, vector<128x128xbf16>
    %cst = arith.constant dense<0.000000e+00> : vector<512x128xf32>
    %2 = tpu.matmul %0, %1, %cst {dimension_numbers = #tpu.dot_dimension_numbers<[1], [0], [0], [1], [0, 0, 1, 1], [], []>} : vector<512x128xbf16>, vector<128x128xbf16>, vector<512x128xf32> -> vector<512x128xf32>
    %c0_3 = arith.constant 0 : index
    %c0_4 = arith.constant 0 : index
    %3 = vector.load %arg4[%c0_3, %c0_4] : memref<1x128xf32, #tpu.memory_space<vmem>>, vector<1x128xf32>
    %4 = vector.broadcast %3 : vector<1x128xf32> to vector<512x128xf32>
    %5 = arith.addf %2, %4 : vector<512x128xf32>
    %cst_5 = arith.constant 0.000000e+00 : f32
    %6 = vector.broadcast %cst_5 : f32 to vector<512x128xf32>
    %7 = arith.maximumf %5, %6 : vector<512x128xf32>
    %8 = arith.truncf %7 : vector<512x128xf32> to vector<512x128xbf16>
    %c0_6 = arith.constant 0 : index
    %c0_7 = arith.constant 0 : index
    %9 = vector.load %arg5[%c0_6, %c0_7] : memref<512x128xbf16, #tpu.memory_space<vmem>>, vector<512x128xbf16>
    tpu.vector_store %arg5[%c0_6, %c0_7], %8 {strides = array<i32>} : memref<512x128xbf16, #tpu.memory_space<vmem>>, vector<512x128xbf16>,
    return
  }
  func.func @transform_0(%arg0: i32, %arg1: i32) -> (i32, i32) {
    %c0_i32 = arith.constant 0 : i32
    %c0_i32_0 = arith.constant 0 : i32
    return %arg0, %c0_i32 : i32, i32
  }
  func.func @transform_1(%arg0: i32, %arg1: i32) -> (i32, i32) {
    %c0_i32 = arith.constant 0 : i32
    %c0_i32_0 = arith.constant 0 : i32
    return %c0_i32, %arg1 : i32, i32
  }
  func.func @transform_2(%arg0: i32, %arg1: i32) -> (i32, i32) {
    %c0_i32 = arith.constant 0 : i32
    %c0_i32_0 = arith.constant 0 : i32
    return %c0_i32, %arg1 : i32, i32
  }
  func.func @transform_3(%arg0: i32, %arg1: i32) -> (i32, i32) {
    %c0_i32 = arith.constant 0 : i32
    return %arg0, %arg1 : i32, i32
  }
}

module attributes {stable_mosaic.version = 11 : i64} {
  func.func @_matmul_bias_relu_kernel(%arg0: i32, %arg1: i32, %arg2: memref<128x256xbf16, #tpu.memory_space<vmem>>, %arg3: memref<256x128xbf16, #tpu.memory_space<vmem>>, %arg4: memref<1x128xf32, #tpu.memory_space<vmem>>, %arg5: memref<128x128xbf16, #tpu.memory_space<vmem>>) attributes {dimension_semantics = [#tpu.dimension_semantics<parallel>, #tpu.dimension_semantics<parallel>], iteration_bounds = array<i64: 1, 1>, scalar_prefetch = 0 : i64, scratch_operands = 0 : i64, tpu.core_type = #tpu.core_type<tc>, window_params = [{transform_indices = @transform_0, window_bounds = array<i64: 128, 256>}, {transform_indices = @transform_1, window_bounds = array<i64: 256, 128>}, {transform_indices = @transform_2, window_bounds = array<i64: 1, 128>}, {transform_indices = @transform_3, window_bounds = array<i64: 128, 128>}]} {
    %c0 = arith.constant 0 : index
    %c0_0 = arith.constant 0 : index
    %0 = vector.load %arg2[%c0, %c0_0] : memref<128x256xbf16, #tpu.memory_space<vmem>>, vector<128x256xbf16>
    %c0_1 = arith.constant 0 : index
    %c0_2 = arith.constant 0 : index
    %1 = vector.load %arg3[%c0_1, %c0_2] : memref<256x128xbf16, #tpu.memory_space<vmem>>, vector<256x128xbf16>
    %cst = arith.constant dense<0.000000e+00> : vector<128x128xf32>
    %2 = tpu.matmul %0, %1, %cst {dimension_numbers = #tpu.dot_dimension_numbers<[1], [0], [0], [1], [0, 0, 1, 1], [], []>} : vector<128x256xbf16>, vector<256x128xbf16>, vector<128x128xf32> -> vector<128x128xf32>
    %c0_3 = arith.constant 0 : index
    %c0_4 = arith.constant 0 : index
    %3 = vector.load %arg4[%c0_3, %c0_4] : memref<1x128xf32, #tpu.memory_space<vmem>>, vector<1x128xf32>
    %4 = vector.broadcast %3 : vector<1x128xf32> to vector<128x128xf32>
    %5 = arith.addf %2, %4 : vector<128x128xf32>
    %cst_5 = arith.constant 0.000000e+00 : f32
    %6 = vector.broadcast %cst_5 : f32 to vector<128x128xf32>
    %7 = arith.maximumf %5, %6 : vector<128x128xf32>
    %8 = arith.truncf %7 : vector<128x128xf32> to vector<128x128xbf16>
    %c0_6 = arith.constant 0 : index
    %c0_7 = arith.constant 0 : index
    %9 = vector.load %arg5[%c0_6, %c0_7] : memref<128x128xbf16, #tpu.memory_space<vmem>>, vector<128x128xbf16>
    tpu.vector_store %arg5[%c0_6, %c0_7], %8 {strides = array<i32>} : memref<128x128xbf16, #tpu.memory_space<vmem>>, vector<128x128xbf16>,
    return
  }
  func.func @transform_0(%arg0: i32, %arg1: i32) -> (i32, i32) {
    %c0_i32 = arith.constant 0 : i32
    %c0_i32_0 = arith.constant 0 : i32
    return %arg0, %c0_i32 : i32, i32
  }
  func.func @transform_1(%arg0: i32, %arg1: i32) -> (i32, i32) {
    %c0_i32 = arith.constant 0 : i32
    %c0_i32_0 = arith.constant 0 : i32
    return %c0_i32, %arg1 : i32, i32
  }
  func.func @transform_2(%arg0: i32, %arg1: i32) -> (i32, i32) {
    %c0_i32 = arith.constant 0 : i32
    %c0_i32_0 = arith.constant 0 : i32
    return %c0_i32, %arg1 : i32, i32
  }
  func.func @transform_3(%arg0: i32, %arg1: i32) -> (i32, i32) {
    %c0_i32 = arith.constant 0 : i32
    return %arg0, %arg1 : i32, i32
  }
}

module attributes {stable_mosaic.version = 11 : i64} {
  func.func @_matmul_bias_relu_kernel(%arg0: i32, %arg1: i32, %arg2: memref<32x384xbf16, #tpu.memory_space<vmem>>, %arg3: memref<384x128xbf16, #tpu.memory_space<vmem>>, %arg4: memref<1x128xf32, #tpu.memory_space<vmem>>, %arg5: memref<32x128xbf16, #tpu.memory_space<vmem>>) attributes {dimension_semantics = [#tpu.dimension_semantics<parallel>, #tpu.dimension_semantics<parallel>], iteration_bounds = array<i64: 1, 1>, scalar_prefetch = 0 : i64, scratch_operands = 0 : i64, tpu.core_type = #tpu.core_type<tc>, window_params = [{transform_indices = @transform_0, window_bounds = array<i64: 32, 384>}, {transform_indices = @transform_1, window_bounds = array<i64: 384, 128>}, {transform_indices = @transform_2, window_bounds = array<i64: 1, 128>}, {transform_indices = @transform_3, window_bounds = array<i64: 32, 128>}]} {
    %c0 = arith.constant 0 : index
    %c0_0 = arith.constant 0 : index
    %0 = vector.load %arg2[%c0, %c0_0] : memref<32x384xbf16, #tpu.memory_space<vmem>>, vector<32x384xbf16>
    %c0_1 = arith.constant 0 : index
    %c0_2 = arith.constant 0 : index
    %1 = vector.load %arg3[%c0_1, %c0_2] : memref<384x128xbf16, #tpu.memory_space<vmem>>, vector<384x128xbf16>
    %cst = arith.constant dense<0.000000e+00> : vector<32x128xf32>
    %2 = tpu.matmul %0, %1, %cst {dimension_numbers = #tpu.dot_dimension_numbers<[1], [0], [0], [1], [0, 0, 1, 1], [], []>} : vector<32x384xbf16>, vector<384x128xbf16>, vector<32x128xf32> -> vector<32x128xf32>
    %c0_3 = arith.constant 0 : index
    %c0_4 = arith.constant 0 : index
    %3 = vector.load %arg4[%c0_3, %c0_4] : memref<1x128xf32, #tpu.memory_space<vmem>>, vector<1x128xf32>
    %4 = vector.broadcast %3 : vector<1x128xf32> to vector<32x128xf32>
    %5 = arith.addf %2, %4 : vector<32x128xf32>
    %cst_5 = arith.constant 0.000000e+00 : f32
    %6 = vector.broadcast %cst_5 : f32 to vector<32x128xf32>
    %7 = arith.maximumf %5, %6 : vector<32x128xf32>
    %8 = arith.truncf %7 : vector<32x128xf32> to vector<32x128xbf16>
    %c0_6 = arith.constant 0 : index
    %c0_7 = arith.constant 0 : index
    %9 = vector.load %arg5[%c0_6, %c0_7] : memref<32x128xbf16, #tpu.memory_space<vmem>>, vector<32x128xbf16>
    tpu.vector_store %arg5[%c0_6, %c0_7], %8 {strides = array<i32>} : memref<32x128xbf16, #tpu.memory_space<vmem>>, vector<32x128xbf16>,
    return
  }
  func.func @transform_0(%arg0: i32, %arg1: i32) -> (i32, i32) {
    %c0_i32 = arith.constant 0 : i32
    %c0_i32_0 = arith.constant 0 : i32
    return %arg0, %c0_i32 : i32, i32
  }
  func.func @transform_1(%arg0: i32, %arg1: i32) -> (i32, i32) {
    %c0_i32 = arith.constant 0 : i32
    %c0_i32_0 = arith.constant 0 : i32
    return %c0_i32, %arg1 : i32, i32
  }
  func.func @transform_2(%arg0: i32, %arg1: i32) -> (i32, i32) {
    %c0_i32 = arith.constant 0 : i32
    %c0_i32_0 = arith.constant 0 : i32
    return %c0_i32, %arg1 : i32, i32
  }
  func.func @transform_3(%arg0: i32, %arg1: i32) -> (i32, i32) {
    %c0_i32 = arith.constant 0 : i32
    return %arg0, %arg1 : i32, i32
  }
}

module attributes {stable_mosaic.version = 11 : i64} {
  func.func @_matmul_bias_relu_kernel(%arg0: i32, %arg1: i32, %arg2: memref<8x640xbf16, #tpu.memory_space<vmem>>, %arg3: memref<640x128xbf16, #tpu.memory_space<vmem>>, %arg4: memref<1x128xf32, #tpu.memory_space<vmem>>, %arg5: memref<8x128xbf16, #tpu.memory_space<vmem>>) attributes {dimension_semantics = [#tpu.dimension_semantics<parallel>, #tpu.dimension_semantics<parallel>], iteration_bounds = array<i64: 1, 1>, scalar_prefetch = 0 : i64, scratch_operands = 0 : i64, tpu.core_type = #tpu.core_type<tc>, window_params = [{transform_indices = @transform_0, window_bounds = array<i64: 8, 640>}, {transform_indices = @transform_1, window_bounds = array<i64: 640, 128>}, {transform_indices = @transform_2, window_bounds = array<i64: 1, 128>}, {transform_indices = @transform_3, window_bounds = array<i64: 8, 128>}]} {
    %c0 = arith.constant 0 : index
    %c0_0 = arith.constant 0 : index
    %0 = vector.load %arg2[%c0, %c0_0] : memref<8x640xbf16, #tpu.memory_space<vmem>>, vector<8x640xbf16>
    %c0_1 = arith.constant 0 : index
    %c0_2 = arith.constant 0 : index
    %1 = vector.load %arg3[%c0_1, %c0_2] : memref<640x128xbf16, #tpu.memory_space<vmem>>, vector<640x128xbf16>
    %cst = arith.constant dense<0.000000e+00> : vector<8x128xf32>
    %2 = tpu.matmul %0, %1, %cst {dimension_numbers = #tpu.dot_dimension_numbers<[1], [0], [0], [1], [0, 0, 1, 1], [], []>} : vector<8x640xbf16>, vector<640x128xbf16>, vector<8x128xf32> -> vector<8x128xf32>
    %c0_3 = arith.constant 0 : index
    %c0_4 = arith.constant 0 : index
    %3 = vector.load %arg4[%c0_3, %c0_4] : memref<1x128xf32, #tpu.memory_space<vmem>>, vector<1x128xf32>
    %4 = vector.broadcast %3 : vector<1x128xf32> to vector<8x128xf32>
    %5 = arith.addf %2, %4 : vector<8x128xf32>
    %cst_5 = arith.constant 0.000000e+00 : f32
    %6 = vector.broadcast %cst_5 : f32 to vector<8x128xf32>
    %7 = arith.maximumf %5, %6 : vector<8x128xf32>
    %8 = arith.truncf %7 : vector<8x128xf32> to vector<8x128xbf16>
    %c0_6 = arith.constant 0 : index
    %c0_7 = arith.constant 0 : index
    %9 = vector.load %arg5[%c0_6, %c0_7] : memref<8x128xbf16, #tpu.memory_space<vmem>>, vector<8x128xbf16>
    tpu.vector_store %arg5[%c0_6, %c0_7], %8 {strides = array<i32>} : memref<8x128xbf16, #tpu.memory_space<vmem>>, vector<8x128xbf16>,
    return
  }
  func.func @transform_0(%arg0: i32, %arg1: i32) -> (i32, i32) {
    %c0_i32 = arith.constant 0 : i32
    %c0_i32_0 = arith.constant 0 : i32
    return %arg0, %c0_i32 : i32, i32
  }
  func.func @transform_1(%arg0: i32, %arg1: i32) -> (i32, i32) {
    %c0_i32 = arith.constant 0 : i32
    %c0_i32_0 = arith.constant 0 : i32
    return %c0_i32, %arg1 : i32, i32
  }
  func.func @transform_2(%arg0: i32, %arg1: i32) -> (i32, i32) {
    %c0_i32 = arith.constant 0 : i32
    %c0_i32_0 = arith.constant 0 : i32
    return %c0_i32, %arg1 : i32, i32
  }
  func.func @transform_3(%arg0: i32, %arg1: i32) -> (i32, i32) {
    %c0_i32 = arith.constant 0 : i32
    return %arg0, %arg1 : i32, i32
  }
}

module attributes {stable_mosaic.version = 11 : i64} {
  func.func @_matmul_bias_relu_kernel(%arg0: i32, %arg1: i32, %arg2: memref<8x1152xbf16, #tpu.memory_space<vmem>>, %arg3: memref<1152x256xbf16, #tpu.memory_space<vmem>>, %arg4: memref<1x256xf32, #tpu.memory_space<vmem>>, %arg5: memref<8x256xbf16, #tpu.memory_space<vmem>>) attributes {dimension_semantics = [#tpu.dimension_semantics<parallel>, #tpu.dimension_semantics<parallel>], iteration_bounds = array<i64: 1, 1>, scalar_prefetch = 0 : i64, scratch_operands = 0 : i64, tpu.core_type = #tpu.core_type<tc>, window_params = [{transform_indices = @transform_0, window_bounds = array<i64: 8, 1152>}, {transform_indices = @transform_1, window_bounds = array<i64: 1152, 256>}, {transform_indices = @transform_2, window_bounds = array<i64: 1, 256>}, {transform_indices = @transform_3, window_bounds = array<i64: 8, 256>}]} {
    %c0 = arith.constant 0 : index
    %c0_0 = arith.constant 0 : index
    %0 = vector.load %arg2[%c0, %c0_0] : memref<8x1152xbf16, #tpu.memory_space<vmem>>, vector<8x1152xbf16>
    %c0_1 = arith.constant 0 : index
    %c0_2 = arith.constant 0 : index
    %1 = vector.load %arg3[%c0_1, %c0_2] : memref<1152x256xbf16, #tpu.memory_space<vmem>>, vector<1152x256xbf16>
    %cst = arith.constant dense<0.000000e+00> : vector<8x256xf32>
    %2 = tpu.matmul %0, %1, %cst {dimension_numbers = #tpu.dot_dimension_numbers<[1], [0], [0], [1], [0, 0, 1, 1], [], []>} : vector<8x1152xbf16>, vector<1152x256xbf16>, vector<8x256xf32> -> vector<8x256xf32>
    %c0_3 = arith.constant 0 : index
    %c0_4 = arith.constant 0 : index
    %3 = vector.load %arg4[%c0_3, %c0_4] : memref<1x256xf32, #tpu.memory_space<vmem>>, vector<1x256xf32>
    %4 = vector.broadcast %3 : vector<1x256xf32> to vector<8x256xf32>
    %5 = arith.addf %2, %4 : vector<8x256xf32>
    %cst_5 = arith.constant 0.000000e+00 : f32
    %6 = vector.broadcast %cst_5 : f32 to vector<8x256xf32>
    %7 = arith.maximumf %5, %6 : vector<8x256xf32>
    %8 = arith.truncf %7 : vector<8x256xf32> to vector<8x256xbf16>
    %c0_6 = arith.constant 0 : index
    %c0_7 = arith.constant 0 : index
    %9 = vector.load %arg5[%c0_6, %c0_7] : memref<8x256xbf16, #tpu.memory_space<vmem>>, vector<8x256xbf16>
    tpu.vector_store %arg5[%c0_6, %c0_7], %8 {strides = array<i32>} : memref<8x256xbf16, #tpu.memory_space<vmem>>, vector<8x256xbf16>,
    return
  }
  func.func @transform_0(%arg0: i32, %arg1: i32) -> (i32, i32) {
    %c0_i32 = arith.constant 0 : i32
    %c0_i32_0 = arith.constant 0 : i32
    return %arg0, %c0_i32 : i32, i32
  }
  func.func @transform_1(%arg0: i32, %arg1: i32) -> (i32, i32) {
    %c0_i32 = arith.constant 0 : i32
    %c0_i32_0 = arith.constant 0 : i32
    return %c0_i32, %arg1 : i32, i32
  }
  func.func @transform_2(%arg0: i32, %arg1: i32) -> (i32, i32) {
    %c0_i32 = arith.constant 0 : i32
    %c0_i32_0 = arith.constant 0 : i32
    return %c0_i32, %arg1 : i32, i32
  }
  func.func @transform_3(%arg0: i32, %arg1: i32) -> (i32, i32) {
    %c0_i32 = arith.constant 0 : i32
    return %arg0, %arg1 : i32, i32
  }
}

</mosaic_0001>

<bundles_post_ra>
// kernel: _lambda_.5
= control target key start
LH: loop header
LB: loop body
LE: loop exit
PB: predicated region body
PF: predicated region fallthrough
CT: control target
= control target key end

     0   :  { %s1860_s1 = inlined_call_operand.vmem [shape: bf16[128,128], index: 1, kind: input, shape index: {}]   ;;  %s1861_s0 = inlined_call_operand.vmem [shape: bf16[512,128], index: 0, kind: input, shape index: {}]   ;;  %s1862_s2 = inlined_call_operand.vmem [shape: f32[1,128], index: 2, kind: input, shape index: {}]   ;;  %s1863_s3 = inlined_call_operand.vmem [shape: bf16[512,128], index: 3, kind: output, shape index: {}]  }
   0x1   :  { %v1515_v0 = vld [vmem:[%s1860_s1] sm:$0xff]   ;;  %v1516_v1 = vld [vmem:[%s1860_s1 + $0x8] sm:$0xff]   ;;  %v1517_v2 = vld [vmem:[%s1860_s1 + $0x10] sm:$0xff]  }
   0x2   :  { %1419 = vmatprep.subr.bf16.mxu0 %v1515_v0  ;;  %1499 = vmatprep.subr.bf16.mxu1 %v1515_v0  ;;  %v1518_v3 = vld [vmem:[%s1860_s1 + $0x18] sm:$0xff]   ;;  %v1523_v4 = vld [vmem:[%s1861_s0] sm:$0xff]   ;;  %v1520_v7 = vld [vmem:[%s1860_s1 + $0x28] sm:$0xff]  }
   0x3   :  { %1420 = vmatpush3.bf16.msra.mxu0 %v1515_v0  ;;  %1507 = vmatpush3.bf16.msra.mxu1 %v1515_v0  ;;  %v1524_v5 = vld [vmem:[%s1861_s0 + $0x80] sm:$0xff]   ;;  %v1521_v8 = vld [vmem:[%s1860_s1 + $0x30] sm:$0xff]   ;;  %v1522_v9 = vld [vmem:[%s1860_s1 + $0x38] sm:$0xff]  }
   0x4   :  { %1421 = vmatprep.subr.bf16.mxu0 %v1516_v1  ;;  %1500 = vmatprep.subr.bf16.mxu1 %v1516_v1  ;;  %v1519_v6 = vld [vmem:[%s1860_s1 + $0x20] sm:$0xff]   ;;  %v1525_v10 = vld [vmem:[%s1861_s0 + $0x8] sm:$0xff]   ;;  %v1527_v12 = vld [vmem:[%s1861_s0 + $0x10] sm:$0xff]  }
   0x5   :  { %1435 = vmatprep.mubr.bf16.mxu0 %v1523_v4  ;;  %1467 = vmatprep.mubr.bf16.mxu1 %v1524_v5  ;;  %v1526_v11 = vld [vmem:[%s1861_s0 + $0x88] sm:$0xff]   ;;  %v1528_v13 = vld [vmem:[%s1861_s0 + $0x90] sm:$0xff]   ;;  %v1529_v14 = vld [vmem:[%s1861_s0 + $0x18] sm:$0xff]  }
   0x6   :  { %v1530_v15 = vld [vmem:[%s1861_s0 + $0x98] sm:$0xff]   ;;  %v1531_v16 = vld [vmem:[%s1861_s0 + $0x20] sm:$0xff]   ;;  %v1533_v18 = vld [vmem:[%s1861_s0 + $0x28] sm:$0xff]  }
   0x7   :  { %1422 = vmatpush3.bf16.msra.mxu0 %v1516_v1  ;;  %1508 = vmatpush3.bf16.msra.mxu1 %v1516_v1  ;;  %v1532_v17 = vld [vmem:[%s1861_s0 + $0xa0] sm:$0xff]   ;;  %v1534_v19 = vld [vmem:[%s1861_s0 + $0xa8] sm:$0xff]   ;;  %v1535_v20 = vld [vmem:[%s1861_s0 + $0x30] sm:$0xff]  }
   0x8   :  { %1423 = vmatprep.subr.bf16.mxu0 %v1517_v2  ;;  %1501 = vmatprep.subr.bf16.mxu1 %v1517_v2  ;;  %v1536_v21 = vld [vmem:[%s1861_s0 + $0xb0] sm:$0xff]   ;;  %v1537_v22 = vld [vmem:[%s1861_s0 + $0x38] sm:$0xff]   ;;  %v1539_v24 = vld [vmem:[%s1861_s0 + $0x40] sm:$0xff]  }
   0x9   :  { %v1538_v23 = vld [vmem:[%s1861_s0 + $0xb8] sm:$0xff]   ;;  %v1540_v25 = vld [vmem:[%s1861_s0 + $0xc0] sm:$0xff]   ;;  %v1541_v26 = vld [vmem:[%s1861_s0 + $0x48] sm:$0xff]  }
   0xa   :  { %v1542_v27 = vld [vmem:[%s1861_s0 + $0xc8] sm:$0xff]   ;;  %v1543_v28 = vld [vmem:[%s1861_s0 + $0x50] sm:$0xff]   ;;  %v1545_v30 = vld [vmem:[%s1861_s0 + $0x58] sm:$0xff]  }
   0xb   :  { %1424 = vmatpush3.bf16.msra.mxu0 %v1517_v2  ;;  %1509 = vmatpush3.bf16.msra.mxu1 %v1517_v2  ;;  %v1544_v29 = vld [vmem:[%s1861_s0 + $0xd0] sm:$0xff]   ;;  %v1546_v31 = vld [vmem:[%s1861_s0 + $0xd8] sm:$0xff]   ;;  %v1547_v32 = vld [vmem:[%s1861_s0 + $0x60] sm:$0xff]  }
   0xc   :  { %1425 = vmatprep.subr.bf16.mxu0 %v1518_v3  ;;  %1502 = vmatprep.subr.bf16.mxu1 %v1518_v3  ;;  %v1548_v33 = vld [vmem:[%s1861_s0 + $0xe0] sm:$0xff]   ;;  %v1549_v34 = vld [vmem:[%s1861_s0 + $0x68] sm:$0xff]   ;;  %v1551_v36 = vld [vmem:[%s1861_s0 + $0x70] sm:$0xff]  }
   0xd   :  { %v1550_v35 = vld [vmem:[%s1861_s0 + $0xe8] sm:$0xff]   ;;  %v1552_v37 = vld [vmem:[%s1861_s0 + $0xf0] sm:$0xff]   ;;  %v1553_v38 = vld [vmem:[%s1861_s0 + $0x78] sm:$0xff]  }
   0xe   :  { %v1554_v39 = vld [vmem:[%s1861_s0 + $0xf8] sm:$0xff]   ;;  %v1698_v40 = vld [vmem:[%s1862_s2] ss:$0 sm:$0xff] }
   0xf   :  { %1426 = vmatpush3.bf16.msra.mxu0 %v1518_v3  ;;  %1510 = vmatpush3.bf16.msra.mxu1 %v1518_v3 }
  0x10   :  { %1427 = vmatprep.subr.bf16.mxu0 %v1519_v6  ;;  %1503 = vmatprep.subr.bf16.mxu1 %v1519_v6 }
  0x13   :  { %1428 = vmatpush3.bf16.msra.mxu0 %v1519_v6  ;;  %1511 = vmatpush3.bf16.msra.mxu1 %v1519_v6 }
  0x14   :  { %1429 = vmatprep.subr.bf16.mxu0 %v1520_v7  ;;  %1504 = vmatprep.subr.bf16.mxu1 %v1520_v7 }
  0x17   :  { %1430 = vmatpush3.bf16.msra.mxu0 %v1520_v7  ;;  %1512 = vmatpush3.bf16.msra.mxu1 %v1520_v7 }
  0x18   :  { %1431 = vmatprep.subr.bf16.mxu0 %v1521_v8  ;;  %1505 = vmatprep.subr.bf16.mxu1 %v1521_v8 }
  0x1b   :  { %1432 = vmatpush3.bf16.msra.mxu0 %v1521_v8  ;;  %1513 = vmatpush3.bf16.msra.mxu1 %v1521_v8 }
  0x1c   :  { %1433 = vmatprep.subr.bf16.mxu0 %v1522_v9  ;;  %1506 = vmatprep.subr.bf16.mxu1 %v1522_v9 }
  0x1f   :  { %1434 = vmatpush3.bf16.msra.mxu0 %v1522_v9  ;;  %1514 = vmatpush3.bf16.msra.mxu1 %v1522_v9 }
  0x22   :  { %1436 = vmatmul.mubr.bf16.vlgmr.msra.gmra.mrb[0].mxu0 %v1525_v10  ;;  %1468 = vmatmul.mubr.bf16.vlgmr.msra.gmra.mrb[0].mxu1 %v1526_v11 }
  0x23   :  { %1439 = vmatprep.mubr.bf16.mxu0 %v1527_v12  ;;  %1471 = vmatprep.mubr.bf16.mxu1 %v1528_v13 }
  0x2a   :  { %1440 = vmatmul.mubr.bf16.gmra.mrb[4].mxu0 %v1529_v14  ;;  %1472 = vmatmul.mubr.bf16.gmra.mrb[4].mxu1 %v1530_v15 }
  0x2b   :  { %1443 = vmatprep.mubr.bf16.mxu0 %v1531_v16  ;;  %1475 = vmatprep.mubr.bf16.mxu1 %v1532_v17 }
  0x32   :  { %1444 = vmatmul.mubr.bf16.gmra.mrb[8].mxu0 %v1533_v18  ;;  %1476 = vmatmul.mubr.bf16.gmra.mrb[8].mxu1 %v1534_v19 }
  0x33   :  { %1447 = vmatprep.mubr.bf16.mxu0 %v1535_v20  ;;  %1479 = vmatprep.mubr.bf16.mxu1 %v1536_v21 }
  0x3a   :  { %1448 = vmatmul.mubr.bf16.gmra.mrb[12].mxu0 %v1537_v22  ;;  %1480 = vmatmul.mubr.bf16.gmra.mrb[12].mxu1 %v1538_v23 }
  0x3b   :  { %1451 = vmatprep.mubr.bf16.mxu0 %v1539_v24  ;;  %1483 = vmatprep.mubr.bf16.mxu1 %v1540_v25 }
  0x42   :  { %1452 = vmatmul.mubr.bf16.gmra.mrb[16].mxu0 %v1541_v26  ;;  %1484 = vmatmul.mubr.bf16.gmra.mrb[16].mxu1 %v1542_v27 }
  0x43   :  { %1455 = vmatprep.mubr.bf16.mxu0 %v1543_v28  ;;  %1487 = vmatprep.mubr.bf16.mxu1 %v1544_v29 }
  0x4a   :  { %1456 = vmatmul.mubr.bf16.gmra.mrb[20].mxu0 %v1545_v30  ;;  %1488 = vmatmul.mubr.bf16.gmra.mrb[20].mxu1 %v1546_v31 }
  0x4b   :  { %1459 = vmatprep.mubr.bf16.mxu0 %v1547_v32  ;;  %1491 = vmatprep.mubr.bf16.mxu1 %v1548_v33 }
  0x52   :  { %1460 = vmatmul.mubr.bf16.gmra.mrb[24].mxu0 %v1549_v34  ;;  %1492 = vmatmul.mubr.bf16.gmra.mrb[24].mxu1 %v1550_v35 }
  0x53   :  { %1463 = vmatprep.mubr.bf16.mxu0 %v1551_v36  ;;  %1495 = vmatprep.mubr.bf16.mxu1 %v1552_v37 }
  0x5a   :  { %1464 = vmatmul.mubr.bf16.gmra.mrb[28].mxu0 %v1553_v38  ;;  %1496 = vmatmul.mubr.bf16.gmra.mrb[28].mxu1 %v1554_v39 }
  0xf5   :  { %v1437_v41 = vpop.f32.mrb[0].mxu0  ;;  %v1469_v42 = vpop.f32.mrb[0].mxu1 }
  0xf6   :  { %v385_v43 = vadd.f32 %v1437_v41, %v1698_v40  ;;  %v513_v44 = vadd.f32 %v1469_v42, %v1698_v40  ;;  %v376_v45 = vpop.f32.mrb[1].mxu0  ;;  %v504_v46 = vpop.f32.mrb[1].mxu1 }
  0xf7   :  { %v377_v47 = vadd.f32 %v1698_v40, %v376_v45  ;;  %v505_v48 = vadd.f32 %v1698_v40, %v504_v46  ;;  %v1438_v49 = vpop.f32.mrb[2].mxu0  ;;  %v1470_v50 = vpop.f32.mrb[2].mxu1 }
  0xf8   :  { %v388_v51 = vadd.f32 %v1438_v49, %v1698_v40  ;;  %v516_v52 = vadd.f32 %v1470_v50, %v1698_v40  ;;  %v379_v53 = vpop.f32.mrb[3].mxu0  ;;  %v507_v54 = vpop.f32.mrb[3].mxu1  ;;  %v633_v57 = vmax.f32 %v385_v43, 0.0  ;;  %v665_v58 = vmax.f32 %v513_v44, 0.0 }
  0xf9   :  { %v380_v55 = vadd.f32 %v1698_v40, %v379_v53  ;;  %v508_v56 = vadd.f32 %v1698_v40, %v507_v54  ;;  %v631_v61 = vmax.f32 %v377_v47, 0.0  ;;  %v663_v62 = vmax.f32 %v505_v48, 0.0 }
  0xfa   :  { %v634_v59 = vmax.f32 %v388_v51, 0.0  ;;  %v666_v60 = vmax.f32 %v516_v52, 0.0 }
  0xfb   :  { %v632_v63 = vmax.f32 %v380_v55, 0.0  ;;  %v664_v0 = vmax.f32 %v508_v56, 0.0 }
  0xfc   :  { %v1196_v1 = vpack.c.bf16 %v634_v59, %v633_v57  ;;  %v1276_v2 = vpack.c.bf16 %v666_v60, %v665_v58 }
  0xfd   :  { %v1191_v3 = vpack.c.bf16 %v632_v63, %v631_v61  ;;  %v1271_v4 = vpack.c.bf16 %v664_v0, %v663_v62  ;;  %v1441_v5 = vpop.f32.mrb[4].mxu0  ;;  %v1473_v6 = vpop.f32.mrb[4].mxu1 }
  0xfe   :  { %1348 = vst [vmem:[%s1863_s3 + $0x8] sm:$0xff] %v1196_v1   ;;  %1364 = vst [vmem:[%s1863_s3 + $0x88] sm:$0xff] %v1276_v2   ;;  %v401_v7 = vadd.f32 %v1441_v5, %v1698_v40  ;;  %v529_v8 = vadd.f32 %v1473_v6, %v1698_v40  ;;  %v392_v9 = vpop.f32.mrb[5].mxu0  ;;  %v520_v10 = vpop.f32.mrb[5].mxu1 }
  0xff   :  { %1192 = vst [vmem:[%s1863_s3] sm:$0xff] %v1191_v3   ;;  %1363 = vst [vmem:[%s1863_s3 + $0x80] sm:$0xff] %v1271_v4   ;;  %v393_v11 = vadd.f32 %v1698_v40, %v392_v9  ;;  %v521_v12 = vadd.f32 %v1698_v40, %v520_v10  ;;  %v1442_v13 = vpop.f32.mrb[6].mxu0  ;;  %v1474_v14 = vpop.f32.mrb[6].mxu1 }
 0x100   :  { %v404_v15 = vadd.f32 %v1442_v13, %v1698_v40  ;;  %v532_v16 = vadd.f32 %v1474_v14, %v1698_v40  ;;  %v395_v17 = vpop.f32.mrb[7].mxu0  ;;  %v523_v18 = vpop.f32.mrb[7].mxu1  ;;  %v637_v21 = vmax.f32 %v401_v7, 0.0  ;;  %v669_v22 = vmax.f32 %v529_v8, 0.0 }
 0x101   :  { %v396_v19 = vadd.f32 %v1698_v40, %v395_v17  ;;  %v524_v20 = vadd.f32 %v1698_v40, %v523_v18  ;;  %v635_v25 = vmax.f32 %v393_v11, 0.0  ;;  %v667_v26 = vmax.f32 %v521_v12, 0.0 }
 0x102   :  { %v638_v23 = vmax.f32 %v404_v15, 0.0  ;;  %v670_v24 = vmax.f32 %v532_v16, 0.0 }
 0x103   :  { %v636_v27 = vmax.f32 %v396_v19, 0.0  ;;  %v668_v28 = vmax.f32 %v524_v20, 0.0 }
 0x104   :  { %v1206_v29 = vpack.c.bf16 %v638_v23, %v637_v21  ;;  %v1286_v30 = vpack.c.bf16 %v670_v24, %v669_v22 }
 0x105   :  { %v1201_v31 = vpack.c.bf16 %v636_v27, %v635_v25  ;;  %v1281_v32 = vpack.c.bf16 %v668_v28, %v667_v26  ;;  %v1445_v33 = vpop.f32.mrb[8].mxu0  ;;  %v1477_v34 = vpop.f32.mrb[8].mxu1 }
 0x106   :  { %1350 = vst [vmem:[%s1863_s3 + $0x18] sm:$0xff] %v1206_v29   ;;  %1366 = vst [vmem:[%s1863_s3 + $0x98] sm:$0xff] %v1286_v30   ;;  %v417_v35 = vadd.f32 %v1445_v33, %v1698_v40  ;;  %v545_v36 = vadd.f32 %v1477_v34, %v1698_v40  ;;  %v408_v37 = vpop.f32.mrb[9].mxu0  ;;  %v536_v38 = vpop.f32.mrb[9].mxu1 }
 0x107   :  { %1349 = vst [vmem:[%s1863_s3 + $0x10] sm:$0xff] %v1201_v31   ;;  %1365 = vst [vmem:[%s1863_s3 + $0x90] sm:$0xff] %v1281_v32   ;;  %v409_v39 = vadd.f32 %v1698_v40, %v408_v37  ;;  %v537_v41 = vadd.f32 %v1698_v40, %v536_v38  ;;  %v1446_v42 = vpop.f32.mrb[10].mxu0  ;;  %v1478_v43 = vpop.f32.mrb[10].mxu1 }
 0x108   :  { %v420_v44 = vadd.f32 %v1446_v42, %v1698_v40  ;;  %v548_v45 = vadd.f32 %v1478_v43, %v1698_v40  ;;  %v411_v46 = vpop.f32.mrb[11].mxu0  ;;  %v539_v47 = vpop.f32.mrb[11].mxu1  ;;  %v641_v50 = vmax.f32 %v417_v35, 0.0  ;;  %v673_v51 = vmax.f32 %v545_v36, 0.0 }
 0x109   :  { %v412_v48 = vadd.f32 %v1698_v40, %v411_v46  ;;  %v540_v49 = vadd.f32 %v1698_v40, %v539_v47  ;;  %v639_v54 = vmax.f32 %v409_v39, 0.0  ;;  %v671_v55 = vmax.f32 %v537_v41, 0.0 }
 0x10a   :  { %v642_v52 = vmax.f32 %v420_v44, 0.0  ;;  %v674_v53 = vmax.f32 %v548_v45, 0.0 }
 0x10b   :  { %v640_v56 = vmax.f32 %v412_v48, 0.0  ;;  %v672_v57 = vmax.f32 %v540_v49, 0.0 }
 0x10c   :  { %v1216_v58 = vpack.c.bf16 %v642_v52, %v641_v50  ;;  %v1296_v59 = vpack.c.bf16 %v674_v53, %v673_v51 }
 0x10d   :  { %v1211_v60 = vpack.c.bf16 %v640_v56, %v639_v54  ;;  %v1291_v61 = vpack.c.bf16 %v672_v57, %v671_v55  ;;  %v1449_v62 = vpop.f32.mrb[12].mxu0  ;;  %v1481_v63 = vpop.f32.mrb[12].mxu1 }
 0x10e   :  { %1352 = vst [vmem:[%s1863_s3 + $0x28] sm:$0xff] %v1216_v58   ;;  %1368 = vst [vmem:[%s1863_s3 + $0xa8] sm:$0xff] %v1296_v59   ;;  %v433_v0 = vadd.f32 %v1449_v62, %v1698_v40  ;;  %v561_v1 = vadd.f32 %v1481_v63, %v1698_v40  ;;  %v424_v2 = vpop.f32.mrb[13].mxu0  ;;  %v552_v3 = vpop.f32.mrb[13].mxu1 }
 0x10f   :  { %1351 = vst [vmem:[%s1863_s3 + $0x20] sm:$0xff] %v1211_v60   ;;  %1367 = vst [vmem:[%s1863_s3 + $0xa0] sm:$0xff] %v1291_v61   ;;  %v425_v4 = vadd.f32 %v1698_v40, %v424_v2  ;;  %v553_v5 = vadd.f32 %v1698_v40, %v552_v3  ;;  %v1450_v6 = vpop.f32.mrb[14].mxu0  ;;  %v1482_v7 = vpop.f32.mrb[14].mxu1 }
 0x110   :  { %v436_v8 = vadd.f32 %v1450_v6, %v1698_v40  ;;  %v564_v9 = vadd.f32 %v1482_v7, %v1698_v40  ;;  %v427_v10 = vpop.f32.mrb[15].mxu0  ;;  %v555_v11 = vpop.f32.mrb[15].mxu1  ;;  %v645_v14 = vmax.f32 %v433_v0, 0.0  ;;  %v677_v15 = vmax.f32 %v561_v1, 0.0 }
 0x111   :  { %v428_v12 = vadd.f32 %v1698_v40, %v427_v10  ;;  %v556_v13 = vadd.f32 %v1698_v40, %v555_v11  ;;  %v643_v18 = vmax.f32 %v425_v4, 0.0  ;;  %v675_v19 = vmax.f32 %v553_v5, 0.0 }
 0x112   :  { %v646_v16 = vmax.f32 %v436_v8, 0.0  ;;  %v678_v17 = vmax.f32 %v564_v9, 0.0 }
 0x113   :  { %v644_v20 = vmax.f32 %v428_v12, 0.0  ;;  %v676_v21 = vmax.f32 %v556_v13, 0.0 }
 0x114   :  { %v1226_v22 = vpack.c.bf16 %v646_v16, %v645_v14  ;;  %v1306_v23 = vpack.c.bf16 %v678_v17, %v677_v15 }
 0x115   :  { %v1221_v24 = vpack.c.bf16 %v644_v20, %v643_v18  ;;  %v1301_v25 = vpack.c.bf16 %v676_v21, %v675_v19  ;;  %v1453_v26 = vpop.f32.mrb[16].mxu0  ;;  %v1485_v27 = vpop.f32.mrb[16].mxu1 }
 0x116   :  { %1354 = vst [vmem:[%s1863_s3 + $0x38] sm:$0xff] %v1226_v22   ;;  %1370 = vst [vmem:[%s1863_s3 + $0xb8] sm:$0xff] %v1306_v23   ;;  %v449_v28 = vadd.f32 %v1453_v26, %v1698_v40  ;;  %v577_v29 = vadd.f32 %v1485_v27, %v1698_v40  ;;  %v440_v30 = vpop.f32.mrb[17].mxu0  ;;  %v568_v31 = vpop.f32.mrb[17].mxu1 }
 0x117   :  { %1353 = vst [vmem:[%s1863_s3 + $0x30] sm:$0xff] %v1221_v24   ;;  %1369 = vst [vmem:[%s1863_s3 + $0xb0] sm:$0xff] %v1301_v25   ;;  %v441_v32 = vadd.f32 %v1698_v40, %v440_v30  ;;  %v569_v33 = vadd.f32 %v1698_v40, %v568_v31  ;;  %v1454_v34 = vpop.f32.mrb[18].mxu0  ;;  %v1486_v35 = vpop.f32.mrb[18].mxu1 }
 0x118   :  { %v452_v36 = vadd.f32 %v1454_v34, %v1698_v40  ;;  %v580_v37 = vadd.f32 %v1486_v35, %v1698_v40  ;;  %v443_v38 = vpop.f32.mrb[19].mxu0  ;;  %v571_v39 = vpop.f32.mrb[19].mxu1  ;;  %v649_v43 = vmax.f32 %v449_v28, 0.0  ;;  %v681_v44 = vmax.f32 %v577_v29, 0.0 }
 0x119   :  { %v444_v41 = vadd.f32 %v1698_v40, %v443_v38  ;;  %v572_v42 = vadd.f32 %v1698_v40, %v571_v39  ;;  %v647_v47 = vmax.f32 %v441_v32, 0.0  ;;  %v679_v48 = vmax.f32 %v569_v33, 0.0 }
 0x11a   :  { %v650_v45 = vmax.f32 %v452_v36, 0.0  ;;  %v682_v46 = vmax.f32 %v580_v37, 0.0 }
 0x11b   :  { %v648_v49 = vmax.f32 %v444_v41, 0.0  ;;  %v680_v50 = vmax.f32 %v572_v42, 0.0 }
 0x11c   :  { %v1236_v51 = vpack.c.bf16 %v650_v45, %v649_v43  ;;  %v1316_v52 = vpack.c.bf16 %v682_v46, %v681_v44 }
 0x11d   :  { %v1231_v53 = vpack.c.bf16 %v648_v49, %v647_v47  ;;  %v1311_v54 = vpack.c.bf16 %v680_v50, %v679_v48  ;;  %v1457_v55 = vpop.f32.mrb[20].mxu0  ;;  %v1489_v56 = vpop.f32.mrb[20].mxu1 }
 0x11e   :  { %1356 = vst [vmem:[%s1863_s3 + $0x48] sm:$0xff] %v1236_v51   ;;  %1372 = vst [vmem:[%s1863_s3 + $0xc8] sm:$0xff] %v1316_v52   ;;  %v465_v57 = vadd.f32 %v1457_v55, %v1698_v40  ;;  %v593_v58 = vadd.f32 %v1489_v56, %v1698_v40  ;;  %v456_v59 = vpop.f32.mrb[21].mxu0  ;;  %v584_v60 = vpop.f32.mrb[21].mxu1 }
 0x11f   :  { %1355 = vst [vmem:[%s1863_s3 + $0x40] sm:$0xff] %v1231_v53   ;;  %1371 = vst [vmem:[%s1863_s3 + $0xc0] sm:$0xff] %v1311_v54   ;;  %v457_v61 = vadd.f32 %v1698_v40, %v456_v59  ;;  %v585_v62 = vadd.f32 %v1698_v40, %v584_v60  ;;  %v1458_v63 = vpop.f32.mrb[22].mxu0  ;;  %v1490_v0 = vpop.f32.mrb[22].mxu1 }
 0x120   :  { %v468_v1 = vadd.f32 %v1458_v63, %v1698_v40  ;;  %v596_v2 = vadd.f32 %v1490_v0, %v1698_v40  ;;  %v459_v3 = vpop.f32.mrb[23].mxu0  ;;  %v587_v4 = vpop.f32.mrb[23].mxu1  ;;  %v653_v7 = vmax.f32 %v465_v57, 0.0  ;;  %v685_v8 = vmax.f32 %v593_v58, 0.0 }
 0x121   :  { %v460_v5 = vadd.f32 %v1698_v40, %v459_v3  ;;  %v588_v6 = vadd.f32 %v1698_v40, %v587_v4  ;;  %v651_v11 = vmax.f32 %v457_v61, 0.0  ;;  %v683_v12 = vmax.f32 %v585_v62, 0.0 }
 0x122   :  { %v654_v9 = vmax.f32 %v468_v1, 0.0  ;;  %v686_v10 = vmax.f32 %v596_v2, 0.0 }
 0x123   :  { %v652_v13 = vmax.f32 %v460_v5, 0.0  ;;  %v684_v14 = vmax.f32 %v588_v6, 0.0 }
 0x124   :  { %v1246_v15 = vpack.c.bf16 %v654_v9, %v653_v7  ;;  %v1326_v16 = vpack.c.bf16 %v686_v10, %v685_v8 }
 0x125   :  { %v1241_v17 = vpack.c.bf16 %v652_v13, %v651_v11  ;;  %v1321_v18 = vpack.c.bf16 %v684_v14, %v683_v12  ;;  %v1461_v19 = vpop.f32.mrb[24].mxu0  ;;  %v1493_v20 = vpop.f32.mrb[24].mxu1 }
 0x126   :  { %1358 = vst [vmem:[%s1863_s3 + $0x58] sm:$0xff] %v1246_v15   ;;  %1374 = vst [vmem:[%s1863_s3 + $0xd8] sm:$0xff] %v1326_v16   ;;  %v481_v21 = vadd.f32 %v1461_v19, %v1698_v40  ;;  %v609_v22 = vadd.f32 %v1493_v20, %v1698_v40  ;;  %v472_v23 = vpop.f32.mrb[25].mxu0  ;;  %v600_v24 = vpop.f32.mrb[25].mxu1 }
 0x127   :  { %1357 = vst [vmem:[%s1863_s3 + $0x50] sm:$0xff] %v1241_v17   ;;  %1373 = vst [vmem:[%s1863_s3 + $0xd0] sm:$0xff] %v1321_v18   ;;  %v473_v25 = vadd.f32 %v1698_v40, %v472_v23  ;;  %v601_v26 = vadd.f32 %v1698_v40, %v600_v24  ;;  %v1462_v27 = vpop.f32.mrb[26].mxu0  ;;  %v1494_v28 = vpop.f32.mrb[26].mxu1 }
 0x128   :  { %v484_v29 = vadd.f32 %v1462_v27, %v1698_v40  ;;  %v612_v30 = vadd.f32 %v1494_v28, %v1698_v40  ;;  %v475_v31 = vpop.f32.mrb[27].mxu0  ;;  %v603_v32 = vpop.f32.mrb[27].mxu1  ;;  %v657_v35 = vmax.f32 %v481_v21, 0.0  ;;  %v689_v36 = vmax.f32 %v609_v22, 0.0 }
 0x129   :  { %v476_v33 = vadd.f32 %v1698_v40, %v475_v31  ;;  %v604_v34 = vadd.f32 %v1698_v40, %v603_v32  ;;  %v655_v39 = vmax.f32 %v473_v25, 0.0  ;;  %v687_v41 = vmax.f32 %v601_v26, 0.0 }
 0x12a   :  { %v658_v37 = vmax.f32 %v484_v29, 0.0  ;;  %v690_v38 = vmax.f32 %v612_v30, 0.0 }
 0x12b   :  { %v656_v42 = vmax.f32 %v476_v33, 0.0  ;;  %v688_v43 = vmax.f32 %v604_v34, 0.0 }
 0x12c   :  { %v1256_v44 = vpack.c.bf16 %v658_v37, %v657_v35  ;;  %v1336_v45 = vpack.c.bf16 %v690_v38, %v689_v36 }
 0x12d   :  { %v1251_v46 = vpack.c.bf16 %v656_v42, %v655_v39  ;;  %v1331_v47 = vpack.c.bf16 %v688_v43, %v687_v41  ;;  %v1465_v48 = vpop.f32.mrb[28].mxu0  ;;  %v1497_v49 = vpop.f32.mrb[28].mxu1 }
 0x12e   :  { %1360 = vst [vmem:[%s1863_s3 + $0x68] sm:$0xff] %v1256_v44   ;;  %1376 = vst [vmem:[%s1863_s3 + $0xe8] sm:$0xff] %v1336_v45   ;;  %v497_v50 = vadd.f32 %v1465_v48, %v1698_v40  ;;  %v625_v51 = vadd.f32 %v1497_v49, %v1698_v40  ;;  %v488_v52 = vpop.f32.mrb[29].mxu0  ;;  %v616_v53 = vpop.f32.mrb[29].mxu1 }
 0x12f   :  { %1359 = vst [vmem:[%s1863_s3 + $0x60] sm:$0xff] %v1251_v46   ;;  %1375 = vst [vmem:[%s1863_s3 + $0xe0] sm:$0xff] %v1331_v47   ;;  %v489_v54 = vadd.f32 %v1698_v40, %v488_v52  ;;  %v617_v55 = vadd.f32 %v1698_v40, %v616_v53  ;;  %v1466_v56 = vpop.f32.mrb[30].mxu0  ;;  %v1498_v57 = vpop.f32.mrb[30].mxu1 }
 0x130   :  { %v500_v58 = vadd.f32 %v1466_v56, %v1698_v40  ;;  %v628_v59 = vadd.f32 %v1498_v57, %v1698_v40  ;;  %v491_v60 = vpop.f32.mrb[31].mxu0  ;;  %v619_v61 = vpop.f32.mrb[31].mxu1  ;;  %v661_v0 = vmax.f32 %v497_v50, 0.0  ;;  %v693_v1 = vmax.f32 %v625_v51, 0.0 }
 0x131   :  { %v492_v62 = vadd.f32 %v1698_v40, %v491_v60  ;;  %v620_v63 = vadd.f32 %v1698_v40, %v619_v61  ;;  %v659_v4 = vmax.f32 %v489_v54, 0.0  ;;  %v691_v5 = vmax.f32 %v617_v55, 0.0 }
 0x132   :  { %v662_v2 = vmax.f32 %v500_v58, 0.0  ;;  %v694_v3 = vmax.f32 %v628_v59, 0.0 }
 0x133   :  { %v660_v6 = vmax.f32 %v492_v62, 0.0  ;;  %v692_v7 = vmax.f32 %v620_v63, 0.0 }
 0x134   :  { %v1266_v8 = vpack.c.bf16 %v662_v2, %v661_v0  ;;  %v1346_v9 = vpack.c.bf16 %v694_v3, %v693_v1 }
 0x135   :  { %v1261_v10 = vpack.c.bf16 %v660_v6, %v659_v4  ;;  %v1341_v11 = vpack.c.bf16 %v692_v7, %v691_v5 }
 0x136   :  { %1362 = vst [vmem:[%s1863_s3 + $0x78] sm:$0xff] %v1266_v8   ;;  %1378 = vst [vmem:[%s1863_s3 + $0xf8] sm:$0xff] %v1346_v9  }
 0x137   :  { %1361 = vst [vmem:[%s1863_s3 + $0x70] sm:$0xff] %v1261_v10   ;;  %1377 = vst [vmem:[%s1863_s3 + $0xf0] sm:$0xff] %v1341_v11  }

// kernel: _lambda_.6
= control target key start
LH: loop header
LB: loop body
LE: loop exit
PB: predicated region body
PF: predicated region fallthrough
CT: control target
= control target key end

     0   :  { %s836_s1 = inlined_call_operand.vmem [shape: bf16[256,128], index: 1, kind: input, shape index: {}]   ;;  %s837_s0 = inlined_call_operand.vmem [shape: bf16[128,256], index: 0, kind: input, shape index: {}]   ;;  %s838_s2 = inlined_call_operand.vmem [shape: f32[1,128], index: 2, kind: input, shape index: {}]   ;;  %s839_s3 = inlined_call_operand.vmem [shape: bf16[128,128], index: 3, kind: output, shape index: {}]  }
   0x1   :  { %v635_v0 = vld [vmem:[%s836_s1 + $0x40] sm:$0xff]   ;;  %v637_v2 = vld [vmem:[%s836_s1 + $0x48] sm:$0xff]   ;;  %v639_v4 = vld [vmem:[%s836_s1 + $0x50] sm:$0xff]  }
   0x2   :  { %v636_v1 = vld [vmem:[%s836_s1] sm:$0xff]   ;;  %555 = vmatprep.subr.bf16.mxu0 %v635_v0  ;;  %619 = vmatprep.subr.bf16.mxu1 %v635_v0  ;;  %v638_v3 = vld [vmem:[%s836_s1 + $0x8] sm:$0xff]   ;;  %v640_v5 = vld [vmem:[%s836_s1 + $0x10] sm:$0xff]  }
   0x3   :  { %556 = vmatpush3.bf16.msra.mxu0 %v636_v1  ;;  %627 = vmatpush3.bf16.msra.mxu1 %v636_v1  ;;  %v641_v6 = vld [vmem:[%s836_s1 + $0x58] sm:$0xff]   ;;  %v643_v8 = vld [vmem:[%s836_s1 + $0x60] sm:$0xff]   ;;  %v645_v10 = vld [vmem:[%s836_s1 + $0x68] sm:$0xff]  }
   0x4   :  { %557 = vmatprep.subr.bf16.mxu0 %v637_v2  ;;  %620 = vmatprep.subr.bf16.mxu1 %v637_v2  ;;  %v642_v7 = vld [vmem:[%s836_s1 + $0x18] sm:$0xff]   ;;  %v644_v9 = vld [vmem:[%s836_s1 + $0x20] sm:$0xff]   ;;  %v646_v13 = vld [vmem:[%s836_s1 + $0x28] sm:$0xff]  }
   0x5   :  { %v653_v11 = vld [vmem:[%s837_s0 + $0x4] ss:$8 sps:$4 sm:$0xff]   ;;  %v647_v14 = vld [vmem:[%s836_s1 + $0x70] sm:$0xff]   ;;  %v649_v16 = vld [vmem:[%s836_s1 + $0x78] sm:$0xff]  }
   0x6   :  { %v656_v12 = vld [vmem:[%s837_s0 + $0x44] ss:$8 sps:$4 sm:$0xff]   ;;  %278 = vmatprep.mubr.bf16.mxu0 %v653_v11  ;;  %v648_v15 = vld [vmem:[%s836_s1 + $0x30] sm:$0xff]   ;;  %v650_v17 = vld [vmem:[%s836_s1 + $0x38] sm:$0xff]  }
   0x7   :  { %558 = vmatpush3.bf16.msra.mxu0 %v638_v3  ;;  %628 = vmatpush3.bf16.msra.mxu1 %v638_v3  ;;  %v651_v18 = vld [vmem:[%s837_s0] ss:$8 sps:$4 sm:$0xff]   ;;  %v657_v20 = vld [vmem:[%s837_s0 + $0x14] ss:$8 sps:$4 sm:$0xff]   ;;  %v661_v22 = vld [vmem:[%s837_s0 + $0x10] ss:$8 sps:$4 sm:$0xff]  }
   0x8   :  { %559 = vmatprep.subr.bf16.mxu0 %v639_v4  ;;  %621 = vmatprep.subr.bf16.mxu1 %v639_v4  ;;  %v654_v19 = vld [vmem:[%s837_s0 + $0x40] ss:$8 sps:$4 sm:$0xff]   ;;  %v659_v21 = vld [vmem:[%s837_s0 + $0x54] ss:$8 sps:$4 sm:$0xff]   ;;  %v662_v23 = vld [vmem:[%s837_s0 + $0x50] ss:$8 sps:$4 sm:$0xff]  }
   0x9   :  { %310 = vmatprep.mubr.bf16.mxu1 %v656_v12  ;;  %v663_v24 = vld [vmem:[%s837_s0 + $0x24] ss:$8 sps:$4 sm:$0xff]   ;;  %v667_v26 = vld [vmem:[%s837_s0 + $0x20] ss:$8 sps:$4 sm:$0xff]   ;;  %v669_v28 = vld [vmem:[%s837_s0 + $0x34] ss:$8 sps:$4 sm:$0xff]  }
   0xa   :  { %v665_v25 = vld [vmem:[%s837_s0 + $0x64] ss:$8 sps:$4 sm:$0xff]   ;;  %v668_v27 = vld [vmem:[%s837_s0 + $0x60] ss:$8 sps:$4 sm:$0xff]   ;;  %v671_v29 = vld [vmem:[%s837_s0 + $0x74] ss:$8 sps:$4 sm:$0xff]  }
   0xb   :  { %560 = vmatpush3.bf16.msra.mxu0 %v640_v5  ;;  %629 = vmatpush3.bf16.msra.mxu1 %v640_v5  ;;  %v673_v30 = vld [vmem:[%s837_s0 + $0x30] ss:$8 sps:$4 sm:$0xff]   ;;  %v794_v34 = vld [vmem:[%s838_s2] ss:$0 sm:$0xff] }
   0xc   :  { %561 = vmatprep.subr.bf16.mxu0 %v641_v6  ;;  %622 = vmatprep.subr.bf16.mxu1 %v641_v6  ;;  %v674_v31 = vld [vmem:[%s837_s0 + $0x70] ss:$8 sps:$4 sm:$0xff]  }
   0xf   :  { %562 = vmatpush3.bf16.msra.mxu0 %v642_v7  ;;  %630 = vmatpush3.bf16.msra.mxu1 %v642_v7 }
  0x10   :  { %563 = vmatprep.subr.bf16.mxu0 %v643_v8  ;;  %623 = vmatprep.subr.bf16.mxu1 %v643_v8 }
  0x13   :  { %564 = vmatpush3.bf16.msra.mxu0 %v644_v9  ;;  %631 = vmatpush3.bf16.msra.mxu1 %v644_v9 }
  0x14   :  { %565 = vmatprep.subr.bf16.mxu0 %v645_v10  ;;  %624 = vmatprep.subr.bf16.mxu1 %v645_v10 }
  0x17   :  { %566 = vmatpush3.bf16.msra.mxu0 %v646_v13  ;;  %632 = vmatpush3.bf16.msra.mxu1 %v646_v13 }
  0x18   :  { %567 = vmatprep.subr.bf16.mxu0 %v647_v14  ;;  %625 = vmatprep.subr.bf16.mxu1 %v647_v14 }
  0x1b   :  { %568 = vmatpush3.bf16.msra.mxu0 %v648_v15  ;;  %633 = vmatpush3.bf16.msra.mxu1 %v648_v15 }
  0x1c   :  { %569 = vmatprep.subr.bf16.mxu0 %v649_v16  ;;  %626 = vmatprep.subr.bf16.mxu1 %v649_v16 }
  0x1f   :  { %570 = vmatpush3.bf16.msra.mxu0 %v650_v17  ;;  %634 = vmatpush3.bf16.msra.mxu1 %v650_v17 }
  0x22   :  { %279 = vmatmul.mubr.bf16.vlgmr.msra.gmra.mrb[0].mxu0 %v651_v18  ;;  %311 = vmatmul.mubr.bf16.vlgmr.msra.gmra.mrb[0].mxu1 %v654_v19 }
  0x23   :  { %286 = vmatprep.mubr.bf16.mxu0 %v657_v20  ;;  %318 = vmatprep.mubr.bf16.mxu1 %v659_v21 }
  0x2a   :  { %287 = vmatmul.mubr.bf16.gmra.mrb[4].mxu0 %v661_v22  ;;  %319 = vmatmul.mubr.bf16.gmra.mrb[4].mxu1 %v662_v23 }
  0x2b   :  { %294 = vmatprep.mubr.bf16.mxu0 %v663_v24  ;;  %326 = vmatprep.mubr.bf16.mxu1 %v665_v25 }
  0x32   :  { %295 = vmatmul.mubr.bf16.gmra.mrb[8].mxu0 %v667_v26  ;;  %327 = vmatmul.mubr.bf16.gmra.mrb[8].mxu1 %v668_v27 }
  0x33   :  { %302 = vmatprep.mubr.bf16.mxu0 %v669_v28  ;;  %334 = vmatprep.mubr.bf16.mxu1 %v671_v29 }
  0x3a   :  { %303 = vmatmul.mubr.bf16.gmra.mrb[12].mxu0 %v673_v30  ;;  %335 = vmatmul.mubr.bf16.gmra.mrb[12].mxu1 %v674_v31 }
  0xf5   :  { %v571_v32 = vpop.f32.mrb[0].mxu0  ;;  %v595_v33 = vpop.f32.mrb[0].mxu1 }
  0xf6   :  { %v572_v35 = vpop.f32.mrb[1].mxu0  ;;  %v596_v36 = vpop.f32.mrb[1].mxu1 }
  0xf7   :  { %v573_v37 = vadd.f32 %v572_v35, %v571_v32  ;;  %v597_v38 = vadd.f32 %v596_v36, %v595_v33  ;;  %v574_v39 = vpop.f32.mrb[2].mxu0  ;;  %v598_v40 = vpop.f32.mrb[2].mxu1 }
  0xf8   :  { %v575_v41 = vpop.f32.mrb[3].mxu0  ;;  %v599_v42 = vpop.f32.mrb[3].mxu1 }
  0xf9   :  { %v281_v43 = vadd.f32 %v573_v37, %v794_v34  ;;  %v313_v44 = vadd.f32 %v597_v38, %v794_v34  ;;  %v576_v45 = vadd.f32 %v575_v41, %v574_v39  ;;  %v600_v46 = vadd.f32 %v599_v42, %v598_v40 }
  0xfb   :  { %v284_v47 = vadd.f32 %v576_v45, %v794_v34  ;;  %v316_v48 = vadd.f32 %v600_v46, %v794_v34  ;;  %v343_v49 = vmax.f32 %v281_v43, 0.0  ;;  %v351_v50 = vmax.f32 %v313_v44, 0.0 }
  0xfd   :  { %v344_v51 = vmax.f32 %v284_v47, 0.0  ;;  %v352_v52 = vmax.f32 %v316_v48, 0.0  ;;  %v577_v53 = vpop.f32.mrb[4].mxu0  ;;  %v601_v54 = vpop.f32.mrb[4].mxu1 }
  0xfe   :  { %v578_v55 = vpop.f32.mrb[5].mxu0  ;;  %v602_v56 = vpop.f32.mrb[5].mxu1 }
  0xff   :  { %v511_v57 = vpack.c.bf16 %v344_v51, %v343_v49  ;;  %v531_v58 = vpack.c.bf16 %v352_v52, %v351_v50  ;;  %v579_v59 = vadd.f32 %v578_v55, %v577_v53  ;;  %v603_v60 = vadd.f32 %v602_v56, %v601_v54  ;;  %v580_v61 = vpop.f32.mrb[6].mxu0  ;;  %v604_v62 = vpop.f32.mrb[6].mxu1 }
 0x100   :  { %v581_v63 = vpop.f32.mrb[7].mxu0  ;;  %v605_v0 = vpop.f32.mrb[7].mxu1 }
 0x101   :  { %512 = vst [vmem:[%s839_s3] sm:$0xff] %v511_v57   ;;  %551 = vst [vmem:[%s839_s3 + $0x20] sm:$0xff] %v531_v58   ;;  %v289_v1 = vadd.f32 %v579_v59, %v794_v34  ;;  %v321_v2 = vadd.f32 %v603_v60, %v794_v34  ;;  %v582_v3 = vadd.f32 %v581_v63, %v580_v61 }
 0x102   :  { %v606_v4 = vadd.f32 %v605_v0, %v604_v62 }
 0x103   :  { %v292_v5 = vadd.f32 %v582_v3, %v794_v34  ;;  %v345_v7 = vmax.f32 %v289_v1, 0.0  ;;  %v353_v8 = vmax.f32 %v321_v2, 0.0 }
 0x104   :  { %v324_v6 = vadd.f32 %v606_v4, %v794_v34 }
 0x105   :  { %v346_v9 = vmax.f32 %v292_v5, 0.0  ;;  %v583_v11 = vpop.f32.mrb[8].mxu0  ;;  %v607_v12 = vpop.f32.mrb[8].mxu1 }
 0x106   :  { %v354_v10 = vmax.f32 %v324_v6, 0.0  ;;  %v584_v13 = vpop.f32.mrb[9].mxu0  ;;  %v608_v14 = vpop.f32.mrb[9].mxu1 }
 0x107   :  { %v516_v15 = vpack.c.bf16 %v346_v9, %v345_v7  ;;  %v585_v17 = vadd.f32 %v584_v13, %v583_v11  ;;  %v609_v18 = vadd.f32 %v608_v14, %v607_v12  ;;  %v586_v19 = vpop.f32.mrb[10].mxu0  ;;  %v610_v20 = vpop.f32.mrb[10].mxu1 }
 0x108   :  { %v536_v16 = vpack.c.bf16 %v354_v10, %v353_v8  ;;  %v587_v21 = vpop.f32.mrb[11].mxu0  ;;  %v611_v22 = vpop.f32.mrb[11].mxu1 }
 0x109   :  { %548 = vst [vmem:[%s839_s3 + $0x8] sm:$0xff] %v516_v15   ;;  %v297_v23 = vadd.f32 %v585_v17, %v794_v34  ;;  %v329_v24 = vadd.f32 %v609_v18, %v794_v34  ;;  %v588_v25 = vadd.f32 %v587_v21, %v586_v19  ;;  %v612_v26 = vadd.f32 %v611_v22, %v610_v20 }
 0x10a   :  { %552 = vst [vmem:[%s839_s3 + $0x28] sm:$0xff] %v536_v16  }
 0x10b   :  { %v300_v27 = vadd.f32 %v588_v25, %v794_v34  ;;  %v332_v28 = vadd.f32 %v612_v26, %v794_v34  ;;  %v347_v29 = vmax.f32 %v297_v23, 0.0  ;;  %v355_v30 = vmax.f32 %v329_v24, 0.0 }
 0x10d   :  { %v348_v31 = vmax.f32 %v300_v27, 0.0  ;;  %v356_v32 = vmax.f32 %v332_v28, 0.0  ;;  %v589_v33 = vpop.f32.mrb[12].mxu0  ;;  %v613_v35 = vpop.f32.mrb[12].mxu1 }
 0x10e   :  { %v590_v36 = vpop.f32.mrb[13].mxu0  ;;  %v614_v37 = vpop.f32.mrb[13].mxu1 }
 0x10f   :  { %v521_v38 = vpack.c.bf16 %v348_v31, %v347_v29  ;;  %v541_v39 = vpack.c.bf16 %v356_v32, %v355_v30  ;;  %v591_v40 = vadd.f32 %v590_v36, %v589_v33  ;;  %v615_v41 = vadd.f32 %v614_v37, %v613_v35  ;;  %v592_v42 = vpop.f32.mrb[14].mxu0  ;;  %v616_v43 = vpop.f32.mrb[14].mxu1 }
 0x110   :  { %v593_v44 = vpop.f32.mrb[15].mxu0  ;;  %v617_v45 = vpop.f32.mrb[15].mxu1 }
 0x111   :  { %549 = vst [vmem:[%s839_s3 + $0x10] sm:$0xff] %v521_v38   ;;  %553 = vst [vmem:[%s839_s3 + $0x30] sm:$0xff] %v541_v39   ;;  %v305_v46 = vadd.f32 %v591_v40, %v794_v34  ;;  %v337_v47 = vadd.f32 %v615_v41, %v794_v34  ;;  %v594_v48 = vadd.f32 %v593_v44, %v592_v42 }
 0x112   :  { %v618_v49 = vadd.f32 %v617_v45, %v616_v43 }
 0x113   :  { %v308_v50 = vadd.f32 %v594_v48, %v794_v34  ;;  %v349_v52 = vmax.f32 %v305_v46, 0.0  ;;  %v357_v53 = vmax.f32 %v337_v47, 0.0 }
 0x114   :  { %v340_v51 = vadd.f32 %v618_v49, %v794_v34 }
 0x115   :  { %v350_v54 = vmax.f32 %v308_v50, 0.0 }
 0x116   :  { %v358_v55 = vmax.f32 %v340_v51, 0.0 }
 0x117   :  { %v526_v56 = vpack.c.bf16 %v350_v54, %v349_v52 }
 0x118   :  { %v546_v57 = vpack.c.bf16 %v358_v55, %v357_v53 }
 0x119   :  { %550 = vst [vmem:[%s839_s3 + $0x18] sm:$0xff] %v526_v56  }
 0x11a   :  { %554 = vst [vmem:[%s839_s3 + $0x38] sm:$0xff] %v546_v57  }

// kernel: _lambda_.7
= control target key start
LH: loop header
LB: loop body
LE: loop exit
PB: predicated region body
PF: predicated region fallthrough
CT: control target
= control target key end

     0   :  { %s639_s1 = inlined_call_operand.vmem [shape: bf16[384,128], index: 1, kind: input, shape index: {}]   ;;  %s640_s0 = inlined_call_operand.vmem [shape: bf16[32,384], index: 0, kind: input, shape index: {}]   ;;  %s641_s2 = inlined_call_operand.vmem [shape: f32[1,128], index: 2, kind: input, shape index: {}]   ;;  %s642_s3 = inlined_call_operand.vmem [shape: bf16[32,128], index: 3, kind: output, shape index: {}]  }
   0x1   :  { %v488_v0 = vld [vmem:[%s639_s1 + $0x40] sm:$0xff]   ;;  %v490_v2 = vld [vmem:[%s639_s1 + $0x48] sm:$0xff]   ;;  %v493_v5 = vld [vmem:[%s639_s1 + $0x50] sm:$0xff]  }
   0x2   :  { %v489_v1 = vld [vmem:[%s639_s1] sm:$0xff]   ;;  %430 = vmatprep.subr.bf16.mxu0 %v488_v0  ;;  %v492_v4 = vld [vmem:[%s639_s1 + $0x8] sm:$0xff]   ;;  %v495_v7 = vld [vmem:[%s639_s1 + $0x10] sm:$0xff]  }
   0x3   :  { %431 = vmatpush3.bf16.msra.mxu0 %v489_v1  ;;  %v491_v3 = vld [vmem:[%s639_s1 + $0x80] sm:$0xff]   ;;  %v494_v6 = vld [vmem:[%s639_s1 + $0x88] sm:$0xff]   ;;  %v496_v8 = vld [vmem:[%s639_s1 + $0x58] sm:$0xff]  }
   0x4   :  { %432 = vmatprep.subr.bf16.mxu0 %v490_v2  ;;  %468 = vmatprep.subr.bf16.mxu1 %v491_v3  ;;  %v497_v9 = vld [vmem:[%s639_s1 + $0x90] sm:$0xff]   ;;  %v498_v10 = vld [vmem:[%s639_s1 + $0x18] sm:$0xff]   ;;  %v499_v11 = vld [vmem:[%s639_s1 + $0x60] sm:$0xff]  }
   0x5   :  { %469 = vmatpush3.bf16.msra.mxu1 %v491_v3  ;;  %v500_v12 = vld [vmem:[%s639_s1 + $0x98] sm:$0xff]   ;;  %v501_v13 = vld [vmem:[%s639_s1 + $0x20] sm:$0xff]   ;;  %v502_v15 = vld [vmem:[%s639_s1 + $0x68] sm:$0xff]  }
   0x6   :  { %470 = vmatprep.subr.bf16.mxu1 %v494_v6  ;;  %v503_v14 = vld [vmem:[%s639_s1 + $0xa0] sm:$0xff]   ;;  %v504_v16 = vld [vmem:[%s639_s1 + $0x28] sm:$0xff]   ;;  %v505_v18 = vld [vmem:[%s639_s1 + $0x70] sm:$0xff]  }
   0x7   :  { %433 = vmatpush3.bf16.msra.mxu0 %v492_v4  ;;  %v506_v17 = vld [vmem:[%s639_s1 + $0xa8] sm:$0xff]   ;;  %v507_v19 = vld [vmem:[%s639_s1 + $0x30] sm:$0xff]   ;;  %v508_v20 = vld [vmem:[%s639_s1 + $0x78] sm:$0xff]  }
   0x8   :  { %434 = vmatprep.subr.bf16.mxu0 %v493_v5  ;;  %v509_v21 = vld [vmem:[%s639_s1 + $0xb0] sm:$0xff]   ;;  %v510_v23 = vld [vmem:[%s639_s1 + $0x38] sm:$0xff]   ;;  %v511_v26 = vld [vmem:[%s640_s0] ss:$12 sps:$4 sm:$0xff]  }
   0x9   :  { %471 = vmatpush3.bf16.msra.mxu1 %v494_v6  ;;  %v513_v22 = vld [vmem:[%s640_s0 + $0x4] ss:$12 sps:$4 sm:$0xff]   ;;  %v515_v24 = vld [vmem:[%s640_s0 + $0x8] ss:$12 sps:$4 sm:$0xff]   ;;  %v514_v25 = vld [vmem:[%s639_s1 + $0xb8] sm:$0xff]  }
   0xa   :  { %472 = vmatprep.subr.bf16.mxu1 %v497_v9  ;;  %286 = vmatprep.mubr.bf16.mxu0 %v513_v22  ;;  %v517_v27 = vld [vmem:[%s640_s0 + $0x1c] ss:$12 sps:$4 sm:$0xff]   ;;  %v516_v28 = vld [vmem:[%s640_s0 + $0x20] ss:$12 sps:$4 sm:$0xff]   ;;  %v519_v29 = vld [vmem:[%s640_s0 + $0x18] ss:$12 sps:$4 sm:$0xff]  }
   0xb   :  { %435 = vmatpush3.bf16.msra.mxu0 %v495_v7  ;;  %484 = vmatprep.mubr.bf16.mxu1 %v515_v24  ;;  %v380_v32 = vld [vmem:[%s641_s2] ss:$0 sm:$0xff] }
   0xc   :  { %436 = vmatprep.subr.bf16.mxu0 %v496_v8 }
   0xd   :  { %473 = vmatpush3.bf16.msra.mxu1 %v497_v9 }
   0xe   :  { %474 = vmatprep.subr.bf16.mxu1 %v500_v12 }
   0xf   :  { %437 = vmatpush3.bf16.msra.mxu0 %v498_v10 }
  0x10   :  { %438 = vmatprep.subr.bf16.mxu0 %v499_v11 }
  0x11   :  { %475 = vmatpush3.bf16.msra.mxu1 %v500_v12 }
  0x12   :  { %476 = vmatprep.subr.bf16.mxu1 %v503_v14 }
  0x13   :  { %439 = vmatpush3.bf16.msra.mxu0 %v501_v13 }
  0x14   :  { %440 = vmatprep.subr.bf16.mxu0 %v502_v15 }
  0x15   :  { %477 = vmatpush3.bf16.msra.mxu1 %v503_v14 }
  0x16   :  { %478 = vmatprep.subr.bf16.mxu1 %v506_v17 }
  0x17   :  { %441 = vmatpush3.bf16.msra.mxu0 %v504_v16 }
  0x18   :  { %442 = vmatprep.subr.bf16.mxu0 %v505_v18 }
  0x19   :  { %479 = vmatpush3.bf16.msra.mxu1 %v506_v17 }
  0x1a   :  { %480 = vmatprep.subr.bf16.mxu1 %v509_v21 }
  0x1b   :  { %443 = vmatpush3.bf16.msra.mxu0 %v507_v19 }
  0x1c   :  { %444 = vmatprep.subr.bf16.mxu0 %v508_v20 }
  0x1d   :  { %481 = vmatpush3.bf16.msra.mxu1 %v509_v21 }
  0x1e   :  { %482 = vmatprep.subr.bf16.mxu1 %v514_v25 }
  0x1f   :  { %445 = vmatpush3.bf16.msra.mxu0 %v510_v23 }
  0x21   :  { %483 = vmatpush3.bf16.msra.mxu1 %v514_v25 }
  0x22   :  { %287 = vmatmul.mubr.bf16.vlgmr.msra.gmra.mrb[0].mxu0 %v511_v26 }
  0x23   :  { %294 = vmatprep.mubr.bf16.mxu0 %v517_v27 }
  0x24   :  { %485 = vmatmul.mubr.bf16.vlgmr.msra.gmra.mrb[0].mxu1 %v516_v28 }
  0x2a   :  { %295 = vmatmul.mubr.bf16.gmra.mrb[4].mxu0 %v519_v29 }
  0xf5   :  { %v446_v30 = vpop.f32.mrb[0].mxu0 }
  0xf6   :  { %v447_v31 = vpop.f32.mrb[1].mxu0 }
  0xf7   :  { %v448_v33 = vadd.f32 %v447_v31, %v446_v30  ;;  %v449_v34 = vpop.f32.mrb[2].mxu0  ;;  %v486_v36 = vpop.f32.mrb[0].mxu1 }
  0xf8   :  { %v450_v35 = vpop.f32.mrb[3].mxu0  ;;  %v337_v39 = vpop.f32.mrb[1].mxu1 }
  0xf9   :  { %v451_v37 = vadd.f32 %v450_v35, %v449_v34  ;;  %v289_v38 = vadd.f32 %v448_v33, %v380_v32  ;;  %v487_v40 = vpop.f32.mrb[2].mxu1 }
  0xfa   :  { %v340_v43 = vpop.f32.mrb[3].mxu1 }
  0xfb   :  { %v338_v41 = vadd.f32 %v337_v39, %v289_v38  ;;  %v292_v42 = vadd.f32 %v451_v37, %v380_v32 }
  0xfd   :  { %v341_v44 = vadd.f32 %v340_v43, %v292_v42  ;;  %v452_v45 = vpop.f32.mrb[4].mxu0  ;;  %v352_v47 = vmax.f32 %v338_v41, 0.0 }
  0xfe   :  { %v453_v46 = vpop.f32.mrb[5].mxu0 }
  0xff   :  { %v353_v48 = vmax.f32 %v341_v44, 0.0  ;;  %v454_v49 = vadd.f32 %v453_v46, %v452_v45  ;;  %v455_v50 = vpop.f32.mrb[6].mxu0 }
 0x100   :  { %v456_v51 = vpop.f32.mrb[7].mxu0 }
 0x101   :  { %v422_v52 = vpack.c.bf16 %v353_v48, %v352_v47  ;;  %v297_v53 = vadd.f32 %v454_v49, %v380_v32  ;;  %v457_v54 = vadd.f32 %v456_v51, %v455_v50 }
 0x103   :  { %423 = vst [vmem:[%s642_s3] sm:$0xff] %v422_v52   ;;  %v346_v55 = vadd.f32 %v486_v36, %v297_v53  ;;  %v300_v56 = vadd.f32 %v457_v54, %v380_v32 }
 0x105   :  { %v349_v57 = vadd.f32 %v487_v40, %v300_v56  ;;  %v354_v58 = vmax.f32 %v346_v55, 0.0 }
 0x107   :  { %v355_v59 = vmax.f32 %v349_v57, 0.0 }
 0x109   :  { %v427_v60 = vpack.c.bf16 %v355_v59, %v354_v58 }
 0x10b   :  { %429 = vst [vmem:[%s642_s3 + $0x8] sm:$0xff] %v427_v60  }

// kernel: _lambda_.8
= control target key start
LH: loop header
LB: loop body
LE: loop exit
PB: predicated region body
PF: predicated region fallthrough
CT: control target
= control target key end

     0   :  { %v656_v35 = vmov 0.0   ;;  %vm657_vm0 = vmmov 0   ;;  %s813_s1 = inlined_call_operand.vmem [shape: bf16[640,128], index: 1, kind: input, shape index: {}]   ;;  %s814_s0 = inlined_call_operand.vmem [shape: bf16[8,640], index: 0, kind: input, shape index: {}]   ;;  %s815_s2 = inlined_call_operand.vmem [shape: f32[1,128], index: 2, kind: input, shape index: {}]   ;;  %s816_s3 = inlined_call_operand.vmem [shape: bf16[8,128], index: 3, kind: output, shape index: {}]  }
   0x1   :  { %v611_v0 = vld [vmem:[%s813_s1 + $0x40] sm:$0xff]   ;;  %v615_v4 = vld [vmem:[%s813_s1 + $0x48] sm:$0xff]   ;;  %v619_v8 = vld [vmem:[%s813_s1 + $0x50] sm:$0xff]  }
   0x2   :  { %v612_v1 = vld [vmem:[%s813_s1] sm:$0xff]   ;;  %536 = vmatprep.subr.bf16.mxu0 %v611_v0  ;;  %v616_v5 = vld [vmem:[%s813_s1 + $0x8] sm:$0xff]   ;;  %v620_v9 = vld [vmem:[%s813_s1 + $0x10] sm:$0xff]  }
   0x3   :  { %v613_v2 = vld [vmem:[%s813_s1 + $0xc0] sm:$0xff]   ;;  %537 = vmatpush3.bf16.msra.mxu0 %v612_v1  ;;  %v617_v6 = vld [vmem:[%s813_s1 + $0xc8] sm:$0xff]   ;;  %v621_v10 = vld [vmem:[%s813_s1 + $0xd0] sm:$0xff]  }
   0x4   :  { %v614_v3 = vld [vmem:[%s813_s1 + $0x80] sm:$0xff]   ;;  %558 = vmatprep.subr.bf16.mxu1 %v613_v2  ;;  %538 = vmatprep.subr.bf16.mxu0 %v615_v4  ;;  %v618_v7 = vld [vmem:[%s813_s1 + $0x88] sm:$0xff]   ;;  %v622_v11 = vld [vmem:[%s813_s1 + $0x90] sm:$0xff]  }
   0x5   :  { %559 = vmatpush3.bf16.msra.mxu1 %v614_v3  ;;  %v623_v12 = vld [vmem:[%s813_s1 + $0x58] sm:$0xff]   ;;  %v627_v16 = vld [vmem:[%s813_s1 + $0x60] sm:$0xff]   ;;  %v631_v20 = vld [vmem:[%s813_s1 + $0x68] sm:$0xff]  }
   0x6   :  { %560 = vmatprep.subr.bf16.mxu1 %v617_v6  ;;  %v624_v13 = vld [vmem:[%s813_s1 + $0x18] sm:$0xff]   ;;  %v628_v17 = vld [vmem:[%s813_s1 + $0x20] sm:$0xff]   ;;  %v632_v21 = vld [vmem:[%s813_s1 + $0x28] sm:$0xff]  }
   0x7   :  { %539 = vmatpush3.bf16.msra.mxu0 %v616_v5  ;;  %v625_v14 = vld [vmem:[%s813_s1 + $0xd8] sm:$0xff]   ;;  %v629_v18 = vld [vmem:[%s813_s1 + $0xe0] sm:$0xff]   ;;  %v633_v22 = vld [vmem:[%s813_s1 + $0xe8] sm:$0xff]  }
   0x8   :  { %540 = vmatprep.subr.bf16.mxu0 %v619_v8  ;;  %v626_v15 = vld [vmem:[%s813_s1 + $0x98] sm:$0xff]   ;;  %v630_v19 = vld [vmem:[%s813_s1 + $0xa0] sm:$0xff]   ;;  %v634_v23 = vld [vmem:[%s813_s1 + $0xa8] sm:$0xff]  }
   0x9   :  { %561 = vmatpush3.bf16.msra.mxu1 %v618_v7  ;;  %v635_v24 = vld [vmem:[%s813_s1 + $0x70] sm:$0xff]   ;;  %v639_v28 = vld [vmem:[%s813_s1 + $0x78] sm:$0xff]   ;;  %v15_v31 = vld [vmem:[%s814_s0] sm:$0xff] }
   0xa   :  { %562 = vmatprep.subr.bf16.mxu1 %v621_v10  ;;  %v636_v25 = vld [vmem:[%s813_s1 + $0x30] sm:$0xff]   ;;  %v640_v29 = vld [vmem:[%s813_s1 + $0x38] sm:$0xff]   ;;  %v491_v32 = vcombine.low %v15_v31, %v15_v31  ;;  %v492_v33 = vcombine.high %v15_v31, %v15_v31  ;;  %v16_v36 = vld [vmem:[%s814_s0 + $0x8] sm:$0xff] }
   0xb   :  { %541 = vmatpush3.bf16.msra.mxu0 %v620_v9  ;;  %v637_v26 = vld [vmem:[%s813_s1 + $0xf0] sm:$0xff]   ;;  %v641_v30 = vld [vmem:[%s813_s1 + $0xf8] sm:$0xff]   ;;  %v493_v37 = vcombine.low %v16_v36, %v16_v36  ;;  %v494_v38 = vcombine.high %v16_v36, %v16_v36  ;;  %v648_v39 = vld [vmem:[%s813_s1 + $0x100] sm:$0xff]  }
   0xc   :  { %542 = vmatprep.subr.bf16.mxu0 %v623_v12  ;;  %v638_v27 = vld [vmem:[%s813_s1 + $0xb0] sm:$0xff]   ;;  %v645_v34 = vld [vmem:[%s813_s1 + $0xb8] sm:$0xff]   ;;  %395 = vmatprep.mubr.bf16.mxu0 %v492_v33  ;;  %v649_v40 = vld [vmem:[%s813_s1 + $0x108] sm:$0xff]  }
   0xd   :  { %563 = vmatpush3.bf16.msra.mxu1 %v622_v11  ;;  %435 = vmatprep.mubr.bf16.mxu1 %v494_v38  ;;  %v650_v41 = vld [vmem:[%s813_s1 + $0x110] sm:$0xff]   ;;  %v651_v42 = vld [vmem:[%s813_s1 + $0x118] sm:$0xff]   ;;  %v652_v43 = vld [vmem:[%s813_s1 + $0x120] sm:$0xff]  }
   0xe   :  { %564 = vmatprep.subr.bf16.mxu1 %v625_v14  ;;  %v653_v44 = vld [vmem:[%s813_s1 + $0x128] sm:$0xff]   ;;  %v654_v45 = vld [vmem:[%s813_s1 + $0x130] sm:$0xff]   ;;  %v655_v46 = vld [vmem:[%s813_s1 + $0x138] sm:$0xff]  }
   0xf   :  { %543 = vmatpush3.bf16.msra.mxu0 %v624_v13  ;;  %v644_v47 = vld [vmem:[%s814_s0 + $0x10] ss:$0 sps:$4 sm:$0xff]   ;;  %v490_v49 = vld [vmem:[%s815_s2] ss:$0 sm:$0xff] }
  0x10   :  { %544 = vmatprep.subr.bf16.mxu0 %v627_v16 }
  0x11   :  { %565 = vmatpush3.bf16.msra.mxu1 %v626_v15 }
  0x12   :  { %566 = vmatprep.subr.bf16.mxu1 %v629_v18 }
  0x13   :  { %545 = vmatpush3.bf16.msra.mxu0 %v628_v17 }
  0x14   :  { %546 = vmatprep.subr.bf16.mxu0 %v631_v20 }
  0x15   :  { %567 = vmatpush3.bf16.msra.mxu1 %v630_v19 }
  0x16   :  { %568 = vmatprep.subr.bf16.mxu1 %v633_v22 }
  0x17   :  { %547 = vmatpush3.bf16.msra.mxu0 %v632_v21 }
  0x18   :  { %548 = vmatprep.subr.bf16.mxu0 %v635_v24 }
  0x19   :  { %569 = vmatpush3.bf16.msra.mxu1 %v634_v23 }
  0x1a   :  { %570 = vmatprep.subr.bf16.mxu1 %v637_v26 }
  0x1b   :  { %549 = vmatpush3.bf16.msra.mxu0 %v636_v25 }
  0x1c   :  { %550 = vmatprep.subr.bf16.mxu0 %v639_v28 }
  0x1d   :  { %571 = vmatpush3.bf16.msra.mxu1 %v638_v27 }
  0x1e   :  { %572 = vmatprep.subr.bf16.mxu1 %v641_v30 }
  0x1f   :  { %551 = vmatpush3.bf16.msra.mxu0 %v640_v29 }
  0x20   :  { %589 = vmatprep.subr.bf16.mxu0 %v656_v35 }
  0x21   :  { %573 = vmatpush3.bf16.msra.mxu1 %v645_v34 }
  0x22   :  { %396 = vmatmul.mubr.bf16.vlgmr.msra.gmra.mrb[0].mxu0 %v491_v32 }
  0x23   :  { %590 = vmatpush3.bf16.msra.mxu0 %v648_v39  ;;  %605 = vmatprep.mubr.msk.bf16.mxu0 %vm657_vm0, %v656_v35 }
  0x24   :  { %436 = vmatmul.mubr.bf16.vlgmr.msra.gmra.mrb[0].mxu1 %v493_v37  ;;  %591 = vmatprep.subr.bf16.mxu0 %v656_v35 }
  0x27   :  { %592 = vmatpush3.bf16.msra.mxu0 %v649_v40 }
  0x28   :  { %593 = vmatprep.subr.bf16.mxu0 %v656_v35 }
  0x2b   :  { %594 = vmatpush3.bf16.msra.mxu0 %v650_v41 }
  0x2c   :  { %595 = vmatprep.subr.bf16.mxu0 %v656_v35 }
  0x2f   :  { %596 = vmatpush3.bf16.msra.mxu0 %v651_v42 }
  0x30   :  { %597 = vmatprep.subr.bf16.mxu0 %v656_v35 }
  0x33   :  { %598 = vmatpush3.bf16.msra.mxu0 %v652_v43 }
  0x34   :  { %599 = vmatprep.subr.bf16.mxu0 %v656_v35 }
  0x37   :  { %600 = vmatpush3.bf16.msra.mxu0 %v653_v44 }
  0x38   :  { %601 = vmatprep.subr.bf16.mxu0 %v656_v35 }
  0x3b   :  { %602 = vmatpush3.bf16.msra.mxu0 %v654_v45 }
  0x3c   :  { %603 = vmatprep.subr.bf16.mxu0 %v656_v35 }
  0x3f   :  { %604 = vmatpush3.bf16.msra.mxu0 %v655_v46 }
  0x42   :  { %606 = vmatmul.mubr.bf16.vlgmr.msra.gmra.mrb[4].mxu0 %v644_v47 }
  0xf5   :  { %v552_v48 = vpop.f32.mrb[0].mxu0 }
  0xf6   :  { %v553_v50 = vpop.f32.mrb[1].mxu0 }
  0xf7   :  { %v554_v51 = vadd.f32 %v553_v50, %v552_v48  ;;  %v555_v52 = vpop.f32.mrb[2].mxu0  ;;  %v574_v53 = vpop.f32.mrb[0].mxu1 }
  0xf8   :  { %v556_v54 = vpop.f32.mrb[3].mxu0  ;;  %v575_v55 = vpop.f32.mrb[1].mxu1 }
  0xf9   :  { %v398_v56 = vadd.f32 %v554_v51, %v490_v49  ;;  %v576_v57 = vadd.f32 %v575_v55, %v574_v53  ;;  %v577_v58 = vpop.f32.mrb[2].mxu1 }
  0xfa   :  { %v578_v59 = vpop.f32.mrb[3].mxu1 }
  0xfb   :  { %v438_v60 = vadd.f32 %v576_v57, %v398_v56 }
 0x115   :  { %v477_v61 = vpop.f32.mrb[4].mxu0 }
 0x116   :  { %v478_v62 = vadd.f32 %v477_v61, %v438_v60  ;;  %v607_v63 = vpop.f32.mrb[5].mxu0 }
 0x117   :  { %v480_v0 = vpop.f32.mrb[6].mxu0 }
 0x118   :  { %v483_v1 = vmax.f32 %v478_v62, 0.0  ;;  %v608_v2 = vpop.f32.mrb[7].mxu0 }
 0x11a   :  { %v484_v3 = vpack.c.bf16 %v483_v1, %v483_v1 }
 0x11c   :  { %485 = vst [vmem:[%s816_s3] sm:$0xf] %v484_v3 }

// kernel: _lambda_.9
= control target key start
LH: loop header
LB: loop body
LE: loop exit
PB: predicated region body
PF: predicated region fallthrough
CT: control target
= control target key end

     0   :  { %s2031_s1 = inlined_call_operand.vmem [shape: bf16[1152,256], index: 1, kind: input, shape index: {}]   ;;  %s2032_s0 = inlined_call_operand.vmem [shape: bf16[8,1152], index: 0, kind: input, shape index: {}]   ;;  %s2033_s2 = inlined_call_operand.vmem [shape: f32[1,256], index: 2, kind: input, shape index: {}]   ;;  %s2034_s3 = inlined_call_operand.vmem [shape: bf16[8,256], index: 3, kind: output, shape index: {}]  }
   0x1   :  { %v1320_v0 = vld [vmem:[%s2031_s1 + $0x4] ss:$8 sps:$4 sm:$0xff]   ;;  %v1324_v2 = vld [vmem:[%s2031_s1] ss:$8 sps:$4 sm:$0xff]   ;;  %v1326_v4 = vld [vmem:[%s2031_s1 + $0x14] ss:$8 sps:$4 sm:$0xff]  }
   0x2   :  { %v1322_v1 = vld [vmem:[%s2031_s1 + $0x204] ss:$8 sps:$4 sm:$0xff]   ;;  %928 = vmatprep.subr.bf16.mxu1 %v1320_v0  ;;  %v1325_v3 = vld [vmem:[%s2031_s1 + $0x200] ss:$8 sps:$4 sm:$0xff]   ;;  %v1328_v5 = vld [vmem:[%s2031_s1 + $0x214] ss:$8 sps:$4 sm:$0xff]  }
   0x3   :  { %1010 = vmatprep.subr.bf16.mxu0 %v1322_v1  ;;  %929 = vmatpush1.bf16.msra.mxu1 %v1324_v2  ;;  %v1330_v6 = vld [vmem:[%s2031_s1 + $0x10] ss:$8 sps:$4 sm:$0xff]   ;;  %v1332_v8 = vld [vmem:[%s2031_s1 + $0x24] ss:$8 sps:$4 sm:$0xff]   ;;  %v1336_v10 = vld [vmem:[%s2031_s1 + $0x20] ss:$8 sps:$4 sm:$0xff]  }
   0x4   :  { %1011 = vmatpush1.bf16.msra.mxu0 %v1325_v3  ;;  %930 = vmatprep.subr.bf16.mxu1 %v1326_v4  ;;  %v1331_v7 = vld [vmem:[%s2031_s1 + $0x210] ss:$8 sps:$4 sm:$0xff]   ;;  %v1334_v9 = vld [vmem:[%s2031_s1 + $0x224] ss:$8 sps:$4 sm:$0xff]   ;;  %v1337_v11 = vld [vmem:[%s2031_s1 + $0x220] ss:$8 sps:$4 sm:$0xff]  }
   0x5   :  { %1012 = vmatprep.subr.bf16.mxu0 %v1328_v5  ;;  %v1338_v12 = vld [vmem:[%s2031_s1 + $0x34] ss:$8 sps:$4 sm:$0xff]   ;;  %v1342_v14 = vld [vmem:[%s2031_s1 + $0x30] ss:$8 sps:$4 sm:$0xff]   ;;  %v1344_v16 = vld [vmem:[%s2031_s1 + $0x44] ss:$8 sps:$4 sm:$0xff]  }
   0x6   :  { %v1340_v13 = vld [vmem:[%s2031_s1 + $0x234] ss:$8 sps:$4 sm:$0xff]   ;;  %v1343_v15 = vld [vmem:[%s2031_s1 + $0x230] ss:$8 sps:$4 sm:$0xff]   ;;  %v1346_v17 = vld [vmem:[%s2031_s1 + $0x244] ss:$8 sps:$4 sm:$0xff]  }
   0x7   :  { %931 = vmatpush1.bf16.msra.mxu1 %v1330_v6  ;;  %v1348_v18 = vld [vmem:[%s2031_s1 + $0x40] ss:$8 sps:$4 sm:$0xff]   ;;  %v1350_v20 = vld [vmem:[%s2031_s1 + $0x54] ss:$8 sps:$4 sm:$0xff]   ;;  %v1354_v22 = vld [vmem:[%s2031_s1 + $0x50] ss:$8 sps:$4 sm:$0xff]  }
   0x8   :  { %1013 = vmatpush1.bf16.msra.mxu0 %v1331_v7  ;;  %932 = vmatprep.subr.bf16.mxu1 %v1332_v8  ;;  %v1349_v19 = vld [vmem:[%s2031_s1 + $0x240] ss:$8 sps:$4 sm:$0xff]   ;;  %v1352_v21 = vld [vmem:[%s2031_s1 + $0x254] ss:$8 sps:$4 sm:$0xff]   ;;  %v1355_v23 = vld [vmem:[%s2031_s1 + $0x250] ss:$8 sps:$4 sm:$0xff]  }
   0x9   :  { %1014 = vmatprep.subr.bf16.mxu0 %v1334_v9  ;;  %v1356_v24 = vld [vmem:[%s2031_s1 + $0x64] ss:$8 sps:$4 sm:$0xff]   ;;  %v1360_v26 = vld [vmem:[%s2031_s1 + $0x60] ss:$8 sps:$4 sm:$0xff]   ;;  %v1362_v28 = vld [vmem:[%s2031_s1 + $0x74] ss:$8 sps:$4 sm:$0xff]  }
   0xa   :  { %v1358_v25 = vld [vmem:[%s2031_s1 + $0x264] ss:$8 sps:$4 sm:$0xff]   ;;  %v1361_v27 = vld [vmem:[%s2031_s1 + $0x260] ss:$8 sps:$4 sm:$0xff]   ;;  %v1364_v29 = vld [vmem:[%s2031_s1 + $0x274] ss:$8 sps:$4 sm:$0xff]  }
   0xb   :  { %933 = vmatpush1.bf16.msra.mxu1 %v1336_v10  ;;  %v1366_v30 = vld [vmem:[%s2031_s1 + $0x70] ss:$8 sps:$4 sm:$0xff]   ;;  %v1368_v32 = vld [vmem:[%s2031_s1 + $0x84] ss:$8 sps:$4 sm:$0xff]   ;;  %v1372_v34 = vld [vmem:[%s2031_s1 + $0x80] ss:$8 sps:$4 sm:$0xff]  }
   0xc   :  { %1015 = vmatpush1.bf16.msra.mxu0 %v1337_v11  ;;  %934 = vmatprep.subr.bf16.mxu1 %v1338_v12  ;;  %v1367_v31 = vld [vmem:[%s2031_s1 + $0x270] ss:$8 sps:$4 sm:$0xff]   ;;  %v1370_v33 = vld [vmem:[%s2031_s1 + $0x284] ss:$8 sps:$4 sm:$0xff]   ;;  %v1373_v35 = vld [vmem:[%s2031_s1 + $0x280] ss:$8 sps:$4 sm:$0xff]  }
   0xd   :  { %1016 = vmatprep.subr.bf16.mxu0 %v1340_v13  ;;  %v1374_v36 = vld [vmem:[%s2031_s1 + $0x94] ss:$8 sps:$4 sm:$0xff]   ;;  %v1378_v38 = vld [vmem:[%s2031_s1 + $0x90] ss:$8 sps:$4 sm:$0xff]   ;;  %v1380_v40 = vld [vmem:[%s2031_s1 + $0xa4] ss:$8 sps:$4 sm:$0xff]  }
   0xe   :  { %v1376_v37 = vld [vmem:[%s2031_s1 + $0x294] ss:$8 sps:$4 sm:$0xff]   ;;  %v1379_v39 = vld [vmem:[%s2031_s1 + $0x290] ss:$8 sps:$4 sm:$0xff]   ;;  %v1382_v41 = vld [vmem:[%s2031_s1 + $0x2a4] ss:$8 sps:$4 sm:$0xff]  }
   0xf   :  { %935 = vmatpush1.bf16.msra.mxu1 %v1342_v14  ;;  %v1384_v42 = vld [vmem:[%s2031_s1 + $0xa0] ss:$8 sps:$4 sm:$0xff]   ;;  %v1386_v44 = vld [vmem:[%s2031_s1 + $0xb4] ss:$8 sps:$4 sm:$0xff]   ;;  %v1390_v47 = vld [vmem:[%s2031_s1 + $0xb0] ss:$8 sps:$4 sm:$0xff]  }
  0x10   :  { %1017 = vmatpush1.bf16.msra.mxu0 %v1343_v15  ;;  %936 = vmatprep.subr.bf16.mxu1 %v1344_v16  ;;  %v1385_v43 = vld [vmem:[%s2031_s1 + $0x2a0] ss:$8 sps:$4 sm:$0xff]   ;;  %v1388_v45 = vld [vmem:[%s2031_s1 + $0x2b4] ss:$8 sps:$4 sm:$0xff]   ;;  %v1391_v49 = vld [vmem:[%s2031_s1 + $0x2b0] ss:$8 sps:$4 sm:$0xff]  }
  0x11   :  { %1018 = vmatprep.subr.bf16.mxu0 %v1346_v17  ;;  %v15_v46 = vld [vmem:[%s2032_s0] sm:$0xff]  ;;  %v17_v50 = vld [vmem:[%s2032_s0 + $0x10] sm:$0xff] }
  0x12   :  { %v1149_v48 = vcombine.high %v15_v46, %v15_v46  ;;  %v1392_v51 = vld [vmem:[%s2031_s1 + $0xc4] ss:$8 sps:$4 sm:$0xff]   ;;  %v1153_v53 = vcombine.high %v17_v50, %v17_v50  ;;  %v1396_v54 = vld [vmem:[%s2031_s1 + $0xc0] ss:$8 sps:$4 sm:$0xff]   ;;  %v1398_v56 = vld [vmem:[%s2031_s1 + $0xd4] ss:$8 sps:$4 sm:$0xff]   ;;  %v1148_v6 = vcombine.low %v15_v46, %v15_v46  ;;  %v1152_v7 = vcombine.low %v17_v50, %v17_v50 }
  0x13   :  { %937 = vmatpush1.bf16.msra.mxu1 %v1348_v18  ;;  %v1394_v52 = vld [vmem:[%s2031_s1 + $0x2c4] ss:$8 sps:$4 sm:$0xff]   ;;  %v1397_v55 = vld [vmem:[%s2031_s1 + $0x2c0] ss:$8 sps:$4 sm:$0xff]   ;;  %v1400_v57 = vld [vmem:[%s2031_s1 + $0x2d4] ss:$8 sps:$4 sm:$0xff]  }
  0x14   :  { %1019 = vmatpush1.bf16.msra.mxu0 %v1349_v19  ;;  %938 = vmatprep.subr.bf16.mxu1 %v1350_v20  ;;  %v1402_v58 = vld [vmem:[%s2031_s1 + $0xd0] ss:$8 sps:$4 sm:$0xff]   ;;  %v1404_v60 = vld [vmem:[%s2031_s1 + $0xe4] ss:$8 sps:$4 sm:$0xff]   ;;  %v1408_v62 = vld [vmem:[%s2031_s1 + $0xe0] ss:$8 sps:$4 sm:$0xff]  }
  0x15   :  { %1020 = vmatprep.subr.bf16.mxu0 %v1352_v21  ;;  %960 = vmatprep.mubr.bf16.mxu1 %v1149_v48  ;;  %v1403_v59 = vld [vmem:[%s2031_s1 + $0x2d0] ss:$8 sps:$4 sm:$0xff]   ;;  %v1406_v61 = vld [vmem:[%s2031_s1 + $0x2e4] ss:$8 sps:$4 sm:$0xff]   ;;  %v1409_v63 = vld [vmem:[%s2031_s1 + $0x2e0] ss:$8 sps:$4 sm:$0xff]  }
  0x16   :  { %1042 = vmatprep.mubr.bf16.mxu0 %v1153_v53  ;;  %v1410_v0 = vld [vmem:[%s2031_s1 + $0xf4] ss:$8 sps:$4 sm:$0xff]   ;;  %v1414_v2 = vld [vmem:[%s2031_s1 + $0xf0] ss:$8 sps:$4 sm:$0xff]   ;;  %v1420_v4 = vld [vmem:[%s2031_s1 + $0x104] ss:$8 sps:$4 sm:$0xff]  }
  0x17   :  { %939 = vmatpush1.bf16.msra.mxu1 %v1354_v22  ;;  %v1412_v1 = vld [vmem:[%s2031_s1 + $0x2f4] ss:$8 sps:$4 sm:$0xff]   ;;  %v1415_v3 = vld [vmem:[%s2031_s1 + $0x2f0] ss:$8 sps:$4 sm:$0xff]   ;;  %v1425_v5 = vld [vmem:[%s2031_s1 + $0x304] ss:$8 sps:$4 sm:$0xff]  }
  0x18   :  { %1021 = vmatpush1.bf16.msra.mxu0 %v1355_v23  ;;  %940 = vmatprep.subr.bf16.mxu1 %v1356_v24  ;;  %v1418_v8 = vld [vmem:[%s2031_s1 + $0x100] ss:$8 sps:$4 sm:$0xff]   ;;  %v1428_v10 = vld [vmem:[%s2031_s1 + $0x114] ss:$8 sps:$4 sm:$0xff]   ;;  %v1426_v12 = vld [vmem:[%s2031_s1 + $0x110] ss:$8 sps:$4 sm:$0xff]  }
  0x19   :  { %1022 = vmatprep.subr.bf16.mxu0 %v1358_v25  ;;  %v1423_v9 = vld [vmem:[%s2031_s1 + $0x300] ss:$8 sps:$4 sm:$0xff]   ;;  %v1431_v11 = vld [vmem:[%s2031_s1 + $0x314] ss:$8 sps:$4 sm:$0xff]   ;;  %v1429_v13 = vld [vmem:[%s2031_s1 + $0x310] ss:$8 sps:$4 sm:$0xff]  }
  0x1a   :  { %v1434_v14 = vld [vmem:[%s2031_s1 + $0x124] ss:$8 sps:$4 sm:$0xff]   ;;  %v1432_v16 = vld [vmem:[%s2031_s1 + $0x120] ss:$8 sps:$4 sm:$0xff]   ;;  %v1440_v18 = vld [vmem:[%s2031_s1 + $0x134] ss:$8 sps:$4 sm:$0xff]  }
  0x1b   :  { %941 = vmatpush1.bf16.msra.mxu1 %v1360_v26  ;;  %v1437_v15 = vld [vmem:[%s2031_s1 + $0x324] ss:$8 sps:$4 sm:$0xff]   ;;  %v1435_v17 = vld [vmem:[%s2031_s1 + $0x320] ss:$8 sps:$4 sm:$0xff]   ;;  %v1443_v19 = vld [vmem:[%s2031_s1 + $0x334] ss:$8 sps:$4 sm:$0xff]  }
  0x1c   :  { %1023 = vmatpush1.bf16.msra.mxu0 %v1361_v27  ;;  %942 = vmatprep.subr.bf16.mxu1 %v1362_v28  ;;  %v1438_v20 = vld [vmem:[%s2031_s1 + $0x130] ss:$8 sps:$4 sm:$0xff]   ;;  %v1446_v22 = vld [vmem:[%s2031_s1 + $0x144] ss:$8 sps:$4 sm:$0xff]   ;;  %v1444_v24 = vld [vmem:[%s2031_s1 + $0x140] ss:$8 sps:$4 sm:$0xff]  }
  0x1d   :  { %1024 = vmatprep.subr.bf16.mxu0 %v1364_v29  ;;  %v1441_v21 = vld [vmem:[%s2031_s1 + $0x330] ss:$8 sps:$4 sm:$0xff]   ;;  %v1449_v23 = vld [vmem:[%s2031_s1 + $0x344] ss:$8 sps:$4 sm:$0xff]   ;;  %v1447_v25 = vld [vmem:[%s2031_s1 + $0x340] ss:$8 sps:$4 sm:$0xff]  }
  0x1e   :  { %v1452_v26 = vld [vmem:[%s2031_s1 + $0x154] ss:$8 sps:$4 sm:$0xff]   ;;  %v1450_v28 = vld [vmem:[%s2031_s1 + $0x150] ss:$8 sps:$4 sm:$0xff]   ;;  %v1482_v50 = vld [vmem:[%s2031_s1 + $0x1a4] ss:$8 sps:$4 sm:$0xff]  }
  0x1f   :  { %943 = vmatpush1.bf16.msra.mxu1 %v1366_v30  ;;  %v1455_v27 = vld [vmem:[%s2031_s1 + $0x354] ss:$8 sps:$4 sm:$0xff]   ;;  %v1453_v29 = vld [vmem:[%s2031_s1 + $0x350] ss:$8 sps:$4 sm:$0xff]   ;;  %v1458_v30 = vld [vmem:[%s2031_s1 + $0x164] ss:$8 sps:$4 sm:$0xff]  }
  0x20   :  { %1025 = vmatpush1.bf16.msra.mxu0 %v1367_v31  ;;  %944 = vmatprep.subr.bf16.mxu1 %v1368_v32  ;;  %v1461_v31 = vld [vmem:[%s2031_s1 + $0x364] ss:$8 sps:$4 sm:$0xff]   ;;  %v1476_v46 = vld [vmem:[%s2031_s1 + $0x194] ss:$8 sps:$4 sm:$0xff]   ;;  %v1474_v48 = vld [vmem:[%s2031_s1 + $0x190] ss:$8 sps:$4 sm:$0xff]  }
  0x21   :  { %1026 = vmatprep.subr.bf16.mxu0 %v1370_v33  ;;  %v1845_v32 = vld [vmem:[%s2032_s0 + $0x8] sm:$0xff]  ;;  %v1850_v33 = vld [vmem:[%s2032_s0 + $0x18] sm:$0xff] }
  0x22   :  { %v1483_v53 = vld [vmem:[%s2031_s1 + $0x3a0] ss:$8 sps:$4 sm:$0xff]  }
  0x23   :  { %945 = vmatpush1.bf16.msra.mxu1 %v1372_v34  ;;  %v1456_v34 = vld [vmem:[%s2031_s1 + $0x160] ss:$8 sps:$4 sm:$0xff]  }
  0x24   :  { %1027 = vmatpush1.bf16.msra.mxu0 %v1373_v35  ;;  %946 = vmatprep.subr.bf16.mxu1 %v1374_v36  ;;  %v1459_v35 = vld [vmem:[%s2031_s1 + $0x360] ss:$8 sps:$4 sm:$0xff]   ;;  %v1151_v36 = vcombine.high %v1845_v32, %v1845_v32 }
  0x25   :  { %1028 = vmatprep.subr.bf16.mxu0 %v1376_v37  ;;  %v1155_v37 = vcombine.high %v1850_v33, %v1850_v33 }
  0x27   :  { %947 = vmatpush1.bf16.msra.mxu1 %v1378_v38  ;;  %v1464_v38 = vld [vmem:[%s2031_s1 + $0x174] ss:$8 sps:$4 sm:$0xff]  }
  0x28   :  { %1029 = vmatpush1.bf16.msra.mxu0 %v1379_v39  ;;  %948 = vmatprep.subr.bf16.mxu1 %v1380_v40  ;;  %v1467_v39 = vld [vmem:[%s2031_s1 + $0x374] ss:$8 sps:$4 sm:$0xff]   ;;  %v1462_v40 = vld [vmem:[%s2031_s1 + $0x170] ss:$8 sps:$4 sm:$0xff]  }
  0x29   :  { %1030 = vmatprep.subr.bf16.mxu0 %v1382_v41  ;;  %v1465_v41 = vld [vmem:[%s2031_s1 + $0x370] ss:$8 sps:$4 sm:$0xff]  }
  0x2b   :  { %949 = vmatpush1.bf16.msra.mxu1 %v1384_v42  ;;  %v1470_v42 = vld [vmem:[%s2031_s1 + $0x184] ss:$8 sps:$4 sm:$0xff]  }
  0x2c   :  { %1031 = vmatpush1.bf16.msra.mxu0 %v1385_v43  ;;  %950 = vmatprep.subr.bf16.mxu1 %v1386_v44  ;;  %v1473_v43 = vld [vmem:[%s2031_s1 + $0x384] ss:$8 sps:$4 sm:$0xff]   ;;  %v1468_v44 = vld [vmem:[%s2031_s1 + $0x180] ss:$8 sps:$4 sm:$0xff]  }
  0x2d   :  { %1032 = vmatprep.subr.bf16.mxu0 %v1388_v45  ;;  %v1471_v45 = vld [vmem:[%s2031_s1 + $0x380] ss:$8 sps:$4 sm:$0xff]  }
  0x2f   :  { %951 = vmatpush1.bf16.msra.mxu1 %v1390_v47  ;;  %v1479_v47 = vld [vmem:[%s2031_s1 + $0x394] ss:$8 sps:$4 sm:$0xff]  }
  0x30   :  { %1033 = vmatpush1.bf16.msra.mxu0 %v1391_v49  ;;  %952 = vmatprep.subr.bf16.mxu1 %v1392_v51  ;;  %v1477_v49 = vld [vmem:[%s2031_s1 + $0x390] ss:$8 sps:$4 sm:$0xff]   ;;  %v1485_v51 = vld [vmem:[%s2031_s1 + $0x3a4] ss:$8 sps:$4 sm:$0xff]  }
  0x31   :  { %1034 = vmatprep.subr.bf16.mxu0 %v1394_v52  ;;  %v1480_v52 = vld [vmem:[%s2031_s1 + $0x1a0] ss:$8 sps:$4 sm:$0xff]  }
  0x33   :  { %953 = vmatpush1.bf16.msra.mxu1 %v1396_v54  ;;  %v1488_v54 = vld [vmem:[%s2031_s1 + $0x1b4] ss:$8 sps:$4 sm:$0xff]  }
  0x34   :  { %1035 = vmatpush1.bf16.msra.mxu0 %v1397_v55  ;;  %954 = vmatprep.subr.bf16.mxu1 %v1398_v56  ;;  %v1491_v55 = vld [vmem:[%s2031_s1 + $0x3b4] ss:$8 sps:$4 sm:$0xff]   ;;  %v1486_v56 = vld [vmem:[%s2031_s1 + $0x1b0] ss:$8 sps:$4 sm:$0xff]  }
  0x35   :  { %1036 = vmatprep.subr.bf16.mxu0 %v1400_v57  ;;  %v1489_v57 = vld [vmem:[%s2031_s1 + $0x3b0] ss:$8 sps:$4 sm:$0xff]  }
  0x37   :  { %955 = vmatpush1.bf16.msra.mxu1 %v1402_v58  ;;  %v1494_v58 = vld [vmem:[%s2031_s1 + $0x1c4] ss:$8 sps:$4 sm:$0xff]  }
  0x38   :  { %1037 = vmatpush1.bf16.msra.mxu0 %v1403_v59  ;;  %956 = vmatprep.subr.bf16.mxu1 %v1404_v60  ;;  %v1497_v59 = vld [vmem:[%s2031_s1 + $0x3c4] ss:$8 sps:$4 sm:$0xff]   ;;  %v1492_v60 = vld [vmem:[%s2031_s1 + $0x1c0] ss:$8 sps:$4 sm:$0xff]  }
  0x39   :  { %1038 = vmatprep.subr.bf16.mxu0 %v1406_v61  ;;  %v1495_v61 = vld [vmem:[%s2031_s1 + $0x3c0] ss:$8 sps:$4 sm:$0xff]  }
  0x3b   :  { %957 = vmatpush1.bf16.msra.mxu1 %v1408_v62  ;;  %v1500_v62 = vld [vmem:[%s2031_s1 + $0x1d4] ss:$8 sps:$4 sm:$0xff]  }
  0x3c   :  { %1039 = vmatpush1.bf16.msra.mxu0 %v1409_v63  ;;  %958 = vmatprep.subr.bf16.mxu1 %v1410_v0  ;;  %v1503_v63 = vld [vmem:[%s2031_s1 + $0x3d4] ss:$8 sps:$4 sm:$0xff]   ;;  %v1498_v0 = vld [vmem:[%s2031_s1 + $0x1d0] ss:$8 sps:$4 sm:$0xff]  }
  0x3d   :  { %1040 = vmatprep.subr.bf16.mxu0 %v1412_v1  ;;  %v1501_v1 = vld [vmem:[%s2031_s1 + $0x3d0] ss:$8 sps:$4 sm:$0xff]  }
  0x3f   :  { %959 = vmatpush1.bf16.msra.mxu1 %v1414_v2  ;;  %v1506_v2 = vld [vmem:[%s2031_s1 + $0x1e4] ss:$8 sps:$4 sm:$0xff]  }
  0x40   :  { %1041 = vmatpush1.bf16.msra.mxu0 %v1415_v3  ;;  %969 = vmatprep.subr.bf16.mxu1 %v1420_v4  ;;  %v1509_v3 = vld [vmem:[%s2031_s1 + $0x3e4] ss:$8 sps:$4 sm:$0xff]   ;;  %v1504_v4 = vld [vmem:[%s2031_s1 + $0x1e0] ss:$8 sps:$4 sm:$0xff]  }
  0x41   :  { %1051 = vmatprep.subr.bf16.mxu0 %v1425_v5  ;;  %v1507_v5 = vld [vmem:[%s2031_s1 + $0x3e0] ss:$8 sps:$4 sm:$0xff]  }
  0x42   :  { %961 = vmatmul.mubr.bf16.vlgmr.msra.gmra.mrb[0].mxu1 %v1148_v6  ;;  %v1512_v6 = vld [vmem:[%s2031_s1 + $0x1f4] ss:$8 sps:$4 sm:$0xff]  }
  0x43   :  { %1043 = vmatmul.mubr.bf16.vlgmr.msra.gmra.mrb[0].mxu0 %v1152_v7  ;;  %970 = vmatpush1.bf16.msra.mxu1 %v1418_v8  ;;  %v1515_v7 = vld [vmem:[%s2031_s1 + $0x3f4] ss:$8 sps:$4 sm:$0xff]   ;;  %v1510_v8 = vld [vmem:[%s2031_s1 + $0x1f0] ss:$8 sps:$4 sm:$0xff]  }
  0x44   :  { %1052 = vmatpush1.bf16.msra.mxu0 %v1423_v9  ;;  %971 = vmatprep.subr.bf16.mxu1 %v1428_v10  ;;  %v1513_v9 = vld [vmem:[%s2031_s1 + $0x3f0] ss:$8 sps:$4 sm:$0xff]   ;;  %v1522_v10 = vld [vmem:[%s2031_s1 + $0x404] ss:$8 sps:$4 sm:$0xff]  }
  0x45   :  { %1053 = vmatprep.subr.bf16.mxu0 %v1431_v11  ;;  %1001 = vmatprep.mubr.bf16.mxu1 %v1151_v36  ;;  %v1150_v11 = vcombine.low %v1845_v32, %v1845_v32 }
  0x46   :  { %1083 = vmatprep.mubr.bf16.mxu0 %v1155_v37  ;;  %v164_v37 = vld [vmem:[%s2033_s2] sm:$0x3] }
  0x47   :  { %972 = vmatpush1.bf16.msra.mxu1 %v1426_v12  ;;  %v1154_v12 = vcombine.low %v1850_v33, %v1850_v33 }
  0x48   :  { %1054 = vmatpush1.bf16.msra.mxu0 %v1429_v13  ;;  %973 = vmatprep.subr.bf16.mxu1 %v1434_v14  ;;  %v1520_v13 = vld [vmem:[%s2031_s1 + $0x400] ss:$8 sps:$4 sm:$0xff]   ;;  %v1525_v14 = vld [vmem:[%s2031_s1 + $0x414] ss:$8 sps:$4 sm:$0xff]  }
  0x49   :  { %1055 = vmatprep.subr.bf16.mxu0 %v1437_v15  ;;  %v1523_v15 = vld [vmem:[%s2031_s1 + $0x410] ss:$8 sps:$4 sm:$0xff]  }
  0x4b   :  { %974 = vmatpush1.bf16.msra.mxu1 %v1432_v16  ;;  %v1545_v16 = vmov 0  }
  0x4c   :  { %1056 = vmatpush1.bf16.msra.mxu0 %v1435_v17  ;;  %975 = vmatprep.subr.bf16.mxu1 %v1440_v18  ;;  %v1528_v17 = vld [vmem:[%s2031_s1 + $0x424] ss:$8 sps:$4 sm:$0xff]   ;;  %v1526_v18 = vld [vmem:[%s2031_s1 + $0x420] ss:$8 sps:$4 sm:$0xff]  }
  0x4d   :  { %1057 = vmatprep.subr.bf16.mxu0 %v1443_v19  ;;  %v1531_v19 = vld [vmem:[%s2031_s1 + $0x434] ss:$8 sps:$4 sm:$0xff]  }
  0x4f   :  { %976 = vmatpush1.bf16.msra.mxu1 %v1438_v20  ;;  %v1529_v20 = vld [vmem:[%s2031_s1 + $0x430] ss:$8 sps:$4 sm:$0xff]  }
  0x50   :  { %1058 = vmatpush1.bf16.msra.mxu0 %v1441_v21  ;;  %977 = vmatprep.subr.bf16.mxu1 %v1446_v22  ;;  %v1534_v21 = vld [vmem:[%s2031_s1 + $0x444] ss:$8 sps:$4 sm:$0xff]   ;;  %v1532_v22 = vld [vmem:[%s2031_s1 + $0x440] ss:$8 sps:$4 sm:$0xff]  }
  0x51   :  { %1059 = vmatprep.subr.bf16.mxu0 %v1449_v23  ;;  %v1537_v23 = vld [vmem:[%s2031_s1 + $0x454] ss:$8 sps:$4 sm:$0xff]  }
  0x53   :  { %978 = vmatpush1.bf16.msra.mxu1 %v1444_v24  ;;  %v1535_v24 = vld [vmem:[%s2031_s1 + $0x450] ss:$8 sps:$4 sm:$0xff]  }
  0x54   :  { %1060 = vmatpush1.bf16.msra.mxu0 %v1447_v25  ;;  %979 = vmatprep.subr.bf16.mxu1 %v1452_v26  ;;  %v1540_v25 = vld [vmem:[%s2031_s1 + $0x464] ss:$8 sps:$4 sm:$0xff]   ;;  %v1538_v26 = vld [vmem:[%s2031_s1 + $0x460] ss:$8 sps:$4 sm:$0xff]  }
  0x55   :  { %1061 = vmatprep.subr.bf16.mxu0 %v1455_v27  ;;  %v1543_v27 = vld [vmem:[%s2031_s1 + $0x474] ss:$8 sps:$4 sm:$0xff]  }
  0x57   :  { %980 = vmatpush1.bf16.msra.mxu1 %v1450_v28  ;;  %v1541_v28 = vld [vmem:[%s2031_s1 + $0x470] ss:$8 sps:$4 sm:$0xff]  }
  0x58   :  { %1062 = vmatpush1.bf16.msra.mxu0 %v1453_v29  ;;  %981 = vmatprep.subr.bf16.mxu1 %v1458_v30  ;;  %v1544_v29 = vld [vmem:[%s2032_s0 + $0x20] ss:$0 sps:$4 sm:$0xff]  }
  0x59   :  { %1063 = vmatprep.subr.bf16.mxu0 %v1461_v31 }
  0x5b   :  { %982 = vmatpush1.bf16.msra.mxu1 %v1456_v34  ;;  %v166_v34 = vlaneseq }
  0x5c   :  { %1064 = vmatpush1.bf16.msra.mxu0 %v1459_v35  ;;  %983 = vmatprep.subr.bf16.mxu1 %v1464_v38 }
  0x5d   :  { %1065 = vmatprep.subr.bf16.mxu0 %v1467_v39  ;;  %v167_v35 = vshrl.u32 %v166_v34, 7 }
  0x5f   :  { %984 = vmatpush1.bf16.msra.mxu1 %v1462_v40  ;;  %v168_v36 = vsub.s32 0, %v167_v35  ;;  %v172_v38 = vsub.s32 1, %v167_v35 }
  0x60   :  { %1066 = vmatpush1.bf16.msra.mxu0 %v1465_v41  ;;  %985 = vmatprep.subr.bf16.mxu1 %v1470_v42 }
  0x61   :  { %1067 = vmatprep.subr.bf16.mxu0 %v1473_v43  ;;  %v169_v39 = vrot.slane %v164_v37, %v168_v36  ;;  %v173_v40 = vrot.slane %v164_v37, %v172_v38 }
  0x63   :  { %986 = vmatpush1.bf16.msra.mxu1 %v1468_v44 }
  0x64   :  { %1068 = vmatpush1.bf16.msra.mxu0 %v1471_v45  ;;  %987 = vmatprep.subr.bf16.mxu1 %v1476_v46 }
  0x65   :  { %1069 = vmatprep.subr.bf16.mxu0 %v1479_v47 }
  0x67   :  { %988 = vmatpush1.bf16.msra.mxu1 %v1474_v48 }
  0x68   :  { %1070 = vmatpush1.bf16.msra.mxu0 %v1477_v49  ;;  %989 = vmatprep.subr.bf16.mxu1 %v1482_v50 }
  0x69   :  { %1071 = vmatprep.subr.bf16.mxu0 %v1485_v51 }
  0x6b   :  { %990 = vmatpush1.bf16.msra.mxu1 %v1480_v52 }
  0x6c   :  { %1072 = vmatpush1.bf16.msra.mxu0 %v1483_v53  ;;  %991 = vmatprep.subr.bf16.mxu1 %v1488_v54 }
  0x6d   :  { %1073 = vmatprep.subr.bf16.mxu0 %v1491_v55 }
  0x6f   :  { %992 = vmatpush1.bf16.msra.mxu1 %v1486_v56 }
  0x70   :  { %1074 = vmatpush1.bf16.msra.mxu0 %v1489_v57  ;;  %993 = vmatprep.subr.bf16.mxu1 %v1494_v58 }
  0x71   :  { %1075 = vmatprep.subr.bf16.mxu0 %v1497_v59 }
  0x73   :  { %994 = vmatpush1.bf16.msra.mxu1 %v1492_v60 }
  0x74   :  { %1076 = vmatpush1.bf16.msra.mxu0 %v1495_v61  ;;  %995 = vmatprep.subr.bf16.mxu1 %v1500_v62 }
  0x75   :  { %1077 = vmatprep.subr.bf16.mxu0 %v1503_v63 }
  0x77   :  { %996 = vmatpush1.bf16.msra.mxu1 %v1498_v0 }
  0x78   :  { %1078 = vmatpush1.bf16.msra.mxu0 %v1501_v1  ;;  %997 = vmatprep.subr.bf16.mxu1 %v1506_v2 }
  0x79   :  { %1079 = vmatprep.subr.bf16.mxu0 %v1509_v3 }
  0x7b   :  { %998 = vmatpush1.bf16.msra.mxu1 %v1504_v4 }
  0x7c   :  { %1080 = vmatpush1.bf16.msra.mxu0 %v1507_v5  ;;  %999 = vmatprep.subr.bf16.mxu1 %v1512_v6 }
  0x7d   :  { %1081 = vmatprep.subr.bf16.mxu0 %v1515_v7 }
  0x7f   :  { %1000 = vmatpush1.bf16.msra.mxu1 %v1510_v8 }
  0x80   :  { %1082 = vmatpush1.bf16.msra.mxu0 %v1513_v9 }
  0x81   :  { %1092 = vmatprep.subr.bf16.mxu0 %v1522_v10 }
  0x82   :  { %1002 = vmatmul.mubr.bf16.vlgmr.msra.gmra.mrb[0].mxu1 %v1150_v11 }
  0x83   :  { %1084 = vmatmul.mubr.bf16.vlgmr.msra.gmra.mrb[0].mxu0 %v1154_v12 }
  0x84   :  { %1093 = vmatpush1.bf16.msra.mxu0 %v1520_v13  ;;  %1124 = vmatprep.mubr.bf16.mxu0 %v1545_v16 }
  0x85   :  { %1094 = vmatprep.subr.bf16.mxu0 %v1525_v14 }
  0x88   :  { %1095 = vmatpush1.bf16.msra.mxu0 %v1523_v15 }
  0x89   :  { %1096 = vmatprep.subr.bf16.mxu0 %v1528_v17 }
  0x8c   :  { %1097 = vmatpush1.bf16.msra.mxu0 %v1526_v18 }
  0x8d   :  { %1098 = vmatprep.subr.bf16.mxu0 %v1531_v19 }
  0x90   :  { %1099 = vmatpush1.bf16.msra.mxu0 %v1529_v20 }
  0x91   :  { %1100 = vmatprep.subr.bf16.mxu0 %v1534_v21 }
  0x94   :  { %1101 = vmatpush1.bf16.msra.mxu0 %v1532_v22 }
  0x95   :  { %1102 = vmatprep.subr.bf16.mxu0 %v1537_v23 }
  0x98   :  { %1103 = vmatpush1.bf16.msra.mxu0 %v1535_v24 }
  0x99   :  { %1104 = vmatprep.subr.bf16.mxu0 %v1540_v25 }
  0x9c   :  { %1105 = vmatpush1.bf16.msra.mxu0 %v1538_v26 }
  0x9d   :  { %1106 = vmatprep.subr.bf16.mxu0 %v1543_v27 }
  0xa0   :  { %1107 = vmatpush1.bf16.msra.mxu0 %v1541_v28 }
  0xa3   :  { %1125 = vmatmul.mubr.bf16.vlgmr.msra.gmra.mrb[0].mxu0 %v1544_v29 }
 0x155   :  { %v1003_v30 = vpop.f32.mrb[0].mxu1 }
 0x156   :  { %v1005_v31 = vpop.f32.mrb[1].mxu1  ;;  %v1303_v41 = vadd.f32 %v1003_v30, %v169_v39 }
 0x157   :  { %v1007_v32 = vpop.f32.mrb[2].mxu1  ;;  %v1305_v42 = vadd.f32 %v1005_v31, %v173_v40 }
 0x158   :  { %v1008_v33 = vpop.f32.mrb[3].mxu1 }
 0x176   :  { %v1126_v43 = vpop.f32.mrb[0].mxu0 }
 0x177   :  { %v1304_v44 = vadd.f32 %v1303_v41, %v1126_v43  ;;  %v1128_v45 = vpop.f32.mrb[1].mxu0 }
 0x178   :  { %v1306_v46 = vadd.f32 %v1305_v42, %v1128_v45  ;;  %v1130_v47 = vpop.f32.mrb[2].mxu0 }
 0x179   :  { %v1133_v48 = vmax.f32 %v1304_v44, 0.0  ;;  %v1131_v49 = vpop.f32.mrb[3].mxu0 }
 0x17a   :  { %v1134_v50 = vmax.f32 %v1306_v46, 0.0 }
 0x17c   :  { %v1302_v51 = vpack.c.bf16 %v1134_v50, %v1133_v48 }
 0x17e   :  { %1143 = vst [vmem:[%s2034_s3] sm:$0xff] %v1302_v51 }

</bundles_post_ra>
